<compile_context>
chip_gen: v7x
topology: tpu7x:2x2x1
jax: 0.10.0
libtpu: 0.0.40
codegen_flags: <defaults>
</compile_context>

<pallas_src>
import functools

import jax
import jax.numpy as jnp
from jax.experimental import pallas as pl
from jax.experimental.pallas import tpu as pltpu


def _conv_bn_kernel(x_ref, w_ref, shift_ref, o_ref, patch_ref, *,
                    stride, dilation, kh, kw, tile_h, wout):
    """One (batch, row-tile) step: im2col -> one MXU matmul -> + BN shift.

    x_ref:     (1, in_span, Wp, Cin_pad)      bf16 input window (incl. halo rows)
    w_ref:     (KH*KW*Cin_pad, Cout_pad)      bf16, BN scale already folded in
    shift_ref: (1, Cout_pad)                  f32 BN shift
    o_ref:     (1, tile_h*Wout, Cout_pad)     lane-dense output slab
    patch_ref: (tile_h*Wout, KH*KW*Cin_pad)   VMEM scratch for the im2col patch
    """
    cin_p = x_ref.shape[-1]
    rows = tile_h * wout
    span_h = (tile_h - 1) * stride + 1
    span_w = (wout - 1) * stride + 1

    # im2col: each tap's window goes into its own 128-lane-aligned slot of the
    # patch, so every scratch store is a full, unmasked lane-tile store.
    for ih in range(kh):
        for iw in range(kw):
            win = x_ref[0,
                        pl.ds(ih * dilation, span_h),
                        pl.ds(iw * dilation, span_w), :]
            if stride > 1:
                win = win[::stride, ::stride, :]          # (tile_h, wout, cin_p)
            col0 = (ih * kw + iw) * cin_p
            patch_ref[:, pl.ds(col0, cin_p)] = win.reshape(rows, cin_p)

    # One big matmul over the full K = KH*KW*Cin_pad contraction (f32 acc).
    acc = jnp.dot(patch_ref[...], w_ref[...], preferred_element_type=jnp.float32)
    o_ref[0] = (acc + shift_ref[...]).astype(o_ref.dtype)   # BN shift epilogue


def basic_conv2d(x_nchw, weight_oihw, gamma, beta, running_mean, running_var,
                 *, stride=1, padding=0, dilation=1, eps=1e-5,
                 tile_h=None, compute_dtype=jnp.bfloat16):
    """Forward of BasicConv2d: BN(Conv2d(x)), NCHW in/out like PyTorch."""
    n, cin, h, w = x_nchw.shape
    cout, _, kh, kw = weight_oihw.shape
    out_dtype = x_nchw.dtype

    hout = (h + 2 * padding - dilation * (kh - 1) - 1) // stride + 1
    wout = (w + 2 * padding - dilation * (kw - 1) - 1) // stride + 1

    if tile_h is None:                       # aim for >=512 output rows / step
        tile_h = max(1, min(hout, -(-512 // max(wout, 1))))
    num_tiles = -(-hout // tile_h)
    rows = tile_h * wout

    # Lane-dense channel padding (multiples of 128 lanes).
    cin_p = -(-cin // 128) * 128
    cout_p = -(-cout // 128) * 128
    kk = kh * kw * cin_p

    # Fold BN (eval mode, running stats) into the conv weights + a shift.
    scale = gamma / jnp.sqrt(running_var + eps)                   # (cout,)
    shift = beta - running_mean * scale                           # (cout,)
    w_hwio = jnp.transpose(weight_oihw, (2, 3, 1, 0)) * scale     # (kh,kw,cin,cout)
    w_mat = jnp.pad(w_hwio, ((0, 0), (0, 0),
                             (0, cin_p - cin), (0, cout_p - cout))
                    ).reshape(kk, cout_p).astype(compute_dtype)
    shift_p = jnp.pad(shift, (0, cout_p - cout)).reshape(1, cout_p).astype(jnp.float32)

    # NHWC, spatial zero pad, channel pad; then cut overlapping row-tile windows
    # (halo handled here so each Pallas block is a plain blocked tile).
    # TODO(synk): the spatial pad + halo-window gather costs one extra HBM round
    # trip of the input; a manual-DMA kernel could stream unpadded rows instead.
    x_nhwc = jnp.transpose(x_nchw, (0, 2, 3, 1)).astype(compute_dtype)
    in_span = (tile_h - 1) * stride + dilation * (kh - 1) + 1
    hp = h + 2 * padding
    need_h = (num_tiles - 1) * tile_h * stride + in_span
    x_pad = jnp.pad(x_nhwc, ((0, 0),
                             (padding, padding + max(0, need_h - hp)),
                             (padding, padding),
                             (0, cin_p - cin)))
    wp = w + 2 * padding
    row0 = jnp.arange(num_tiles) * (tile_h * stride)
    gidx = row0[:, None] + jnp.arange(in_span)[None, :]           # (num_tiles, in_span)
    x_tiles = x_pad[:, gidx]                                      # (n, nt, in_span, wp, cin_p)
    x_tiles = x_tiles.reshape(n * num_tiles, in_span, wp, cin_p)

    kernel = functools.partial(_conv_bn_kernel, stride=stride, dilation=dilation,
                               kh=kh, kw=kw, tile_h=tile_h, wout=wout)

    out = pl.pallas_call(
        kernel,
        out_shape=jax.ShapeDtypeStruct((n * num_tiles, rows, cout_p), out_dtype),
        grid_spec=pltpu.PrefetchScalarGridSpec(
            num_scalar_prefetch=0,
            grid=(n, num_tiles),
            in_specs=[
                pl.BlockSpec((1, in_span, wp, cin_p),
                             lambda b, r: (b * num_tiles + r, 0, 0, 0)),
                pl.BlockSpec((kk, cout_p), lambda b, r: (0, 0)),
                pl.BlockSpec((1, cout_p), lambda b, r: (0, 0)),
            ],
            out_specs=pl.BlockSpec((1, rows, cout_p),
                                   lambda b, r: (b * num_tiles + r, 0, 0)),
            scratch_shapes=[pltpu.VMEM((rows, kk), compute_dtype)],
        ),
        compiler_params=pltpu.CompilerParams(
            dimension_semantics=("parallel", "parallel"),
            vmem_limit_bytes=64 * 1024 * 1024),
    )(x_tiles, w_mat, shift_p)

    out = out.reshape(n, num_tiles * tile_h, wout, cout_p)[:, :hout, :, :cout]
    return jnp.transpose(out, (0, 3, 1, 2))                       # back to NCHW


if __name__ == "__main__":
    # BasicConv2d(in_planes=4, out_planes=8, kernel_size=3, stride=1, padding=1)
    N, CIN, H, W = 2, 4, 16, 16
    COUT, K = 8, 3
    STRIDE, PAD, DIL = 1, 1, 1
    EPS = 1e-5

    key = jax.random.PRNGKey(0)
    kx, kw_, kg, kb, km, kv = jax.random.split(key, 6)

    x = jax.random.normal(kx, (N, CIN, H, W), jnp.float32)
    weight = jax.random.normal(kw_, (COUT, CIN, K, K), jnp.float32) * 0.1
    gamma = jax.random.uniform(kg, (COUT,), jnp.float32, 0.5, 1.5)
    beta = jax.random.normal(kb, (COUT,), jnp.float32) * 0.1
    running_mean = jax.random.normal(km, (COUT,), jnp.float32) * 0.1
    running_var = jax.random.uniform(kv, (COUT,), jnp.float32, 0.5, 1.5)
    # TODO(synk): BatchNorm is eval-mode (running stats); PyTorch training-mode
    # batch statistics are not computed in-kernel.

    out = basic_conv2d(x, weight, gamma, beta, running_mean, running_var,
                       stride=STRIDE, padding=PAD, dilation=DIL, eps=EPS,
                       tile_h=8)
    out = jax.block_until_ready(out)
    assert out.shape == (N, COUT, H, W)

    # Reference 1: same bf16-rounded inputs + f32 accumulation (matches the
    # kernel's numerics up to accumulation order).
    scale = gamma / jnp.sqrt(running_var + EPS)
    shift = beta - running_mean * scale
    w_folded = weight * scale[:, None, None, None]
    x_bf = x.astype(jnp.bfloat16).astype(jnp.float32)
    w_bf = w_folded.astype(jnp.bfloat16).astype(jnp.float32)
    ref_matched = jax.lax.conv_general_dilated(
        x_bf, w_bf, window_strides=(STRIDE, STRIDE),
        padding=((PAD, PAD), (PAD, PAD)), rhs_dilation=(DIL, DIL),
        dimension_numbers=("NCHW", "OIHW", "NCHW"),
        preferred_element_type=jnp.float32) + shift[None, :, None, None]
    err1 = float(jnp.max(jnp.abs(out - ref_matched)))
    assert jnp.allclose(out, ref_matched, atol=2e-2, rtol=2e-2), err1

    # Reference 2: full-f32 module semantics (conv + eval-mode BN); loose
    # tolerance only covers the bf16 input/weight rounding.
    ref_f32 = jax.lax.conv_general_dilated(
        x, weight, window_strides=(STRIDE, STRIDE),
        padding=((PAD, PAD), (PAD, PAD)), rhs_dilation=(DIL, DIL),
        dimension_numbers=("NCHW", "OIHW", "NCHW"),
        precision=jax.lax.Precision.HIGHEST)
    ref_f32 = ref_f32 * scale[None, :, None, None] + shift[None, :, None, None]
    err2 = float(jnp.max(jnp.abs(out - ref_f32)))
    assert jnp.allclose(out, ref_f32, atol=1e-1, rtol=1e-1), err2

    print("KERNEL_OK")
</pallas_src>

<mosaic_0001>
module attributes {stable_mosaic.version = 11 : i64} {
  func.func @_conv_bn_kernel(%arg0: i32, %arg1: i32, %arg2: memref<1x10x18x128xbf16, #tpu.memory_space<vmem>>, %arg3: memref<1152x128xbf16, #tpu.memory_space<vmem>>, %arg4: memref<1x128xf32, #tpu.memory_space<vmem>>, %arg5: memref<1x128x128xf32, #tpu.memory_space<vmem>>, %arg6: memref<128x1152xbf16, #tpu.memory_space<vmem>>) attributes {dimension_semantics = [#tpu.dimension_semantics<parallel>, #tpu.dimension_semantics<parallel>], iteration_bounds = array<i64: 2, 2>, scalar_prefetch = 0 : i64, scratch_operands = 1 : i64, tpu.core_type = #tpu.core_type<tc>, window_params = [{transform_indices = @transform_0, window_bounds = array<i64: 1, 10, 18, 128>}, {pipeline_mode = #tpu.pipeline_mode<synchronous>, transform_indices = @transform_1, window_bounds = array<i64: 1152, 128>}, {pipeline_mode = #tpu.pipeline_mode<synchronous>, transform_indices = @transform_2, window_bounds = array<i64: 1, 128>}, {transform_indices = @transform_3, window_bounds = array<i64: 1, 128, 128>}]} {
    %c0 = arith.constant 0 : index
    %c0_0 = arith.constant 0 : index
    %c0_1 = arith.constant 0 : index
    %c0_2 = arith.constant 0 : index
    %0 = vector.load %arg2[%c0, %c0_0, %c0_1, %c0_2] : memref<1x10x18x128xbf16, #tpu.memory_space<vmem>>, vector<1x8x16x128xbf16>
    %1 = vector.shape_cast %0 : vector<1x8x16x128xbf16> to vector<8x16x128xbf16>
    %2 = vector.shape_cast %1 : vector<8x16x128xbf16> to vector<128x128xbf16>
    %c0_3 = arith.constant 0 : index
    %c0_4 = arith.constant 0 : index
    %3 = vector.load %arg6[%c0_3, %c0_4] : memref<128x1152xbf16, #tpu.memory_space<vmem>>, vector<128x128xbf16>
    tpu.vector_store %arg6[%c0_3, %c0_4], %2 {strides = array<i32>} : memref<128x1152xbf16, #tpu.memory_space<vmem>>, vector<128x128xbf16>,
    %c0_5 = arith.constant 0 : index
    %c0_6 = arith.constant 0 : index
    %c1 = arith.constant 1 : index
    %c0_7 = arith.constant 0 : index
    %4 = vector.load %arg2[%c0_5, %c0_6, %c1, %c0_7] : memref<1x10x18x128xbf16, #tpu.memory_space<vmem>>, vector<1x8x16x128xbf16>
    %5 = vector.shape_cast %4 : vector<1x8x16x128xbf16> to vector<8x16x128xbf16>
    %6 = vector.shape_cast %5 : vector<8x16x128xbf16> to vector<128x128xbf16>
    %c0_8 = arith.constant 0 : index
    %c128 = arith.constant 128 : index
    %7 = vector.load %arg6[%c0_8, %c128] : memref<128x1152xbf16, #tpu.memory_space<vmem>>, vector<128x128xbf16>
    tpu.vector_store %arg6[%c0_8, %c128], %6 {strides = array<i32>} : memref<128x1152xbf16, #tpu.memory_space<vmem>>, vector<128x128xbf16>,
    %c0_9 = arith.constant 0 : index
    %c0_10 = arith.constant 0 : index
    %c2 = arith.constant 2 : index
    %c0_11 = arith.constant 0 : index
    %8 = vector.load %arg2[%c0_9, %c0_10, %c2, %c0_11] : memref<1x10x18x128xbf16, #tpu.memory_space<vmem>>, vector<1x8x16x128xbf16>
    %9 = vector.shape_cast %8 : vector<1x8x16x128xbf16> to vector<8x16x128xbf16>
    %10 = vector.shape_cast %9 : vector<8x16x128xbf16> to vector<128x128xbf16>
    %c0_12 = arith.constant 0 : index
    %c256 = arith.constant 256 : index
    %11 = vector.load %arg6[%c0_12, %c256] : memref<128x1152xbf16, #tpu.memory_space<vmem>>, vector<128x128xbf16>
    tpu.vector_store %arg6[%c0_12, %c256], %10 {strides = array<i32>} : memref<128x1152xbf16, #tpu.memory_space<vmem>>, vector<128x128xbf16>,
    %c0_13 = arith.constant 0 : index
    %c1_14 = arith.constant 1 : index
    %c0_15 = arith.constant 0 : index
    %c0_16 = arith.constant 0 : index
    %12 = vector.load %arg2[%c0_13, %c1_14, %c0_15, %c0_16] : memref<1x10x18x128xbf16, #tpu.memory_space<vmem>>, vector<1x8x16x128xbf16>
    %13 = vector.shape_cast %12 : vector<1x8x16x128xbf16> to vector<8x16x128xbf16>
    %14 = vector.shape_cast %13 : vector<8x16x128xbf16> to vector<128x128xbf16>
    %c0_17 = arith.constant 0 : index
    %c384 = arith.constant 384 : index
    %15 = vector.load %arg6[%c0_17, %c384] : memref<128x1152xbf16, #tpu.memory_space<vmem>>, vector<128x128xbf16>
    tpu.vector_store %arg6[%c0_17, %c384], %14 {strides = array<i32>} : memref<128x1152xbf16, #tpu.memory_space<vmem>>, vector<128x128xbf16>,
    %c0_18 = arith.constant 0 : index
    %c1_19 = arith.constant 1 : index
    %c1_20 = arith.constant 1 : index
    %c0_21 = arith.constant 0 : index
    %16 = vector.load %arg2[%c0_18, %c1_19, %c1_20, %c0_21] : memref<1x10x18x128xbf16, #tpu.memory_space<vmem>>, vector<1x8x16x128xbf16>
    %17 = vector.shape_cast %16 : vector<1x8x16x128xbf16> to vector<8x16x128xbf16>
    %18 = vector.shape_cast %17 : vector<8x16x128xbf16> to vector<128x128xbf16>
    %c0_22 = arith.constant 0 : index
    %c512 = arith.constant 512 : index
    %19 = vector.load %arg6[%c0_22, %c512] : memref<128x1152xbf16, #tpu.memory_space<vmem>>, vector<128x128xbf16>
    tpu.vector_store %arg6[%c0_22, %c512], %18 {strides = array<i32>} : memref<128x1152xbf16, #tpu.memory_space<vmem>>, vector<128x128xbf16>,
    %c0_23 = arith.constant 0 : index
    %c1_24 = arith.constant 1 : index
    %c2_25 = arith.constant 2 : index
    %c0_26 = arith.constant 0 : index
    %20 = vector.load %arg2[%c0_23, %c1_24, %c2_25, %c0_26] : memref<1x10x18x128xbf16, #tpu.memory_space<vmem>>, vector<1x8x16x128xbf16>
    %21 = vector.shape_cast %20 : vector<1x8x16x128xbf16> to vector<8x16x128xbf16>
    %22 = vector.shape_cast %21 : vector<8x16x128xbf16> to vector<128x128xbf16>
    %c0_27 = arith.constant 0 : index
    %c640 = arith.constant 640 : index
    %23 = vector.load %arg6[%c0_27, %c640] : memref<128x1152xbf16, #tpu.memory_space<vmem>>, vector<128x128xbf16>
    tpu.vector_store %arg6[%c0_27, %c640], %22 {strides = array<i32>} : memref<128x1152xbf16, #tpu.memory_space<vmem>>, vector<128x128xbf16>,
    %c0_28 = arith.constant 0 : index
    %c2_29 = arith.constant 2 : index
    %c0_30 = arith.constant 0 : index
    %c0_31 = arith.constant 0 : index
    %24 = vector.load %arg2[%c0_28, %c2_29, %c0_30, %c0_31] : memref<1x10x18x128xbf16, #tpu.memory_space<vmem>>, vector<1x8x16x128xbf16>
    %25 = vector.shape_cast %24 : vector<1x8x16x128xbf16> to vector<8x16x128xbf16>
    %26 = vector.shape_cast %25 : vector<8x16x128xbf16> to vector<128x128xbf16>
    %c0_32 = arith.constant 0 : index
    %c768 = arith.constant 768 : index
    %27 = vector.load %arg6[%c0_32, %c768] : memref<128x1152xbf16, #tpu.memory_space<vmem>>, vector<128x128xbf16>
    tpu.vector_store %arg6[%c0_32, %c768], %26 {strides = array<i32>} : memref<128x1152xbf16, #tpu.memory_space<vmem>>, vector<128x128xbf16>,
    %c0_33 = arith.constant 0 : index
    %c2_34 = arith.constant 2 : index
    %c1_35 = arith.constant 1 : index
    %c0_36 = arith.constant 0 : index
    %28 = vector.load %arg2[%c0_33, %c2_34, %c1_35, %c0_36] : memref<1x10x18x128xbf16, #tpu.memory_space<vmem>>, vector<1x8x16x128xbf16>
    %29 = vector.shape_cast %28 : vector<1x8x16x128xbf16> to vector<8x16x128xbf16>
    %30 = vector.shape_cast %29 : vector<8x16x128xbf16> to vector<128x128xbf16>
    %c0_37 = arith.constant 0 : index
    %c896 = arith.constant 896 : index
    %31 = vector.load %arg6[%c0_37, %c896] : memref<128x1152xbf16, #tpu.memory_space<vmem>>, vector<128x128xbf16>
    tpu.vector_store %arg6[%c0_37, %c896], %30 {strides = array<i32>} : memref<128x1152xbf16, #tpu.memory_space<vmem>>, vector<128x128xbf16>,
    %c0_38 = arith.constant 0 : index
    %c2_39 = arith.constant 2 : index
    %c2_40 = arith.constant 2 : index
    %c0_41 = arith.constant 0 : index
    %32 = vector.load %arg2[%c0_38, %c2_39, %c2_40, %c0_41] : memref<1x10x18x128xbf16, #tpu.memory_space<vmem>>, vector<1x8x16x128xbf16>
    %33 = vector.shape_cast %32 : vector<1x8x16x128xbf16> to vector<8x16x128xbf16>
    %34 = vector.shape_cast %33 : vector<8x16x128xbf16> to vector<128x128xbf16>
    %c0_42 = arith.constant 0 : index
    %c1024 = arith.constant 1024 : index
    %35 = vector.load %arg6[%c0_42, %c1024] : memref<128x1152xbf16, #tpu.memory_space<vmem>>, vector<128x128xbf16>
    tpu.vector_store %arg6[%c0_42, %c1024], %34 {strides = array<i32>} : memref<128x1152xbf16, #tpu.memory_space<vmem>>, vector<128x128xbf16>,
    %c0_43 = arith.constant 0 : index
    %c0_44 = arith.constant 0 : index
    %36 = vector.load %arg6[%c0_43, %c0_44] : memref<128x1152xbf16, #tpu.memory_space<vmem>>, vector<128x1152xbf16>
    %c0_45 = arith.constant 0 : index
    %c0_46 = arith.constant 0 : index
    %37 = vector.load %arg3[%c0_45, %c0_46] : memref<1152x128xbf16, #tpu.memory_space<vmem>>, vector<1152x128xbf16>
    %cst = arith.constant dense<0.000000e+00> : vector<128x128xf32>
    %38 = tpu.matmul %36, %37, %cst {dimension_numbers = #tpu.dot_dimension_numbers<[1], [0], [0], [1], [0, 0, 1, 1], [], []>} : vector<128x1152xbf16>, vector<1152x128xbf16>, vector<128x128xf32> -> vector<128x128xf32>
    %c0_47 = arith.constant 0 : index
    %c0_48 = arith.constant 0 : index
    %39 = vector.load %arg4[%c0_47, %c0_48] : memref<1x128xf32, #tpu.memory_space<vmem>>, vector<1x128xf32>
    %40 = vector.broadcast %39 : vector<1x128xf32> to vector<128x128xf32>
    %41 = arith.addf %38, %40 : vector<128x128xf32>
    %c0_49 = arith.constant 0 : index
    %c0_50 = arith.constant 0 : index
    %c0_51 = arith.constant 0 : index
    %42 = vector.load %arg5[%c0_49, %c0_50, %c0_51] : memref<1x128x128xf32, #tpu.memory_space<vmem>>, vector<1x128x128xf32>
    %43 = vector.shape_cast %42 : vector<1x128x128xf32> to vector<128x128xf32>
    %44 = vector.shape_cast %41 : vector<128x128xf32> to vector<1x128x128xf32>
    tpu.vector_store %arg5[%c0_49, %c0_50, %c0_51], %44 {strides = array<i32>} : memref<1x128x128xf32, #tpu.memory_space<vmem>>, vector<1x128x128xf32>,
    return
  }
  func.func @transform_0(%arg0: i32, %arg1: i32) -> (i32, i32, i32, i32) {
    %c2_i32 = arith.constant 2 : i32
    %0 = arith.muli %arg0, %c2_i32 : i32
    %1 = arith.addi %0, %arg1 : i32
    %c0_i32 = arith.constant 0 : i32
    %c0_i32_0 = arith.constant 0 : i32
    %c0_i32_1 = arith.constant 0 : i32
    %c0_i32_2 = arith.constant 0 : i32
    return %1, %c0_i32, %c0_i32_0, %c0_i32_1 : i32, i32, i32, i32
  }
  func.func @transform_1(%arg0: i32, %arg1: i32) -> (i32, i32) {
    %c0_i32 = arith.constant 0 : i32
    %c0_i32_0 = arith.constant 0 : i32
    %c0_i32_1 = arith.constant 0 : i32
    return %c0_i32, %c0_i32_0 : i32, i32
  }
  func.func @transform_2(%arg0: i32, %arg1: i32) -> (i32, i32) {
    %c0_i32 = arith.constant 0 : i32
    %c0_i32_0 = arith.constant 0 : i32
    %c0_i32_1 = arith.constant 0 : i32
    return %c0_i32, %c0_i32_0 : i32, i32
  }
  func.func @transform_3(%arg0: i32, %arg1: i32) -> (i32, i32, i32) {
    %c2_i32 = arith.constant 2 : i32
    %0 = arith.muli %arg0, %c2_i32 : i32
    %1 = arith.addi %0, %arg1 : i32
    %c0_i32 = arith.constant 0 : i32
    %c0_i32_0 = arith.constant 0 : i32
    %c0_i32_1 = arith.constant 0 : i32
    return %1, %c0_i32, %c0_i32_0 : i32, i32, i32
  }
}

</mosaic_0001>

<bundles_post_ra>
// kernel: tpu_custom_call.1
= control target key start
LH: loop header
LB: loop body
LE: loop exit
PB: predicated region body
PF: predicated region fallthrough
CT: control target
= control target key end

     0   :  { %s4813_s0 = inlined_call_operand.hbm [shape: bf16[4,10,18,128], index: 0, kind: input, shape index: {}]   ;;  %s4814_s1 = inlined_call_operand.hbm [shape: bf16[1152,128], index: 1, kind: input, shape index: {}]   ;;  %s4815_s2 = inlined_call_operand.hbm [shape: f32[1,128], index: 2, kind: input, shape index: {}]   ;;  %s4816_s3 = inlined_call_operand.hbm [shape: f32[4,128,128], index: 3, kind: output, shape index: {}]  }
   0x1   :  { %4824 = sst [smem:[#allocation14_spill]] %s4814_s1 }
   0x2   :  { %4825 = sst [smem:[#allocation15_spill]] %s4815_s2 }
   0x3   :  { %8 = vsyncpa [#allocation4], 0 }
   0x4   :  { %10 = vsyncpa [#allocation4 + $0x1], 0 }
   0x5   :  { %11 = vsyncpa [#allocation7], 0 }
   0x6   :  { %12 = vsyncpa [#allocation5], 0 }
   0x7   :  { %14 = vsyncpa [#allocation5 + $0x1], 0  ;;  %s4006_s12 = smov 0   ;;  %s4008_s13 = smov 0  }
   0x8   :  { %s4010_s14 = smov 0   ;;  %s4012_s15 = smov 0  }
   0x9   :  { %s4014_s16 = smov 0   ;;  %s4016_s17 = smov 0  }
   0xa   :  { %s4018_s18 = smov 0   ;;  %s4020_s19 = smov 0  }
   0xb LB: > { %4826 = sst [smem:[#allocation13_spill]] %s3972_s18  ;;  %s2946_s20 = sadd.s32 4294967295, %s3976_s19   ;;  %s3976_s19 = sphi %s4020_s19, %s20_s19   ;;  %s3972_s18 = sphi %s4018_s18, %s4855_s18   ;;  %s3968_s17 = sphi %s4016_s17, %s4854_s17   ;;  %s3964_s16 = sphi %s4014_s16, %s4849_s16   ;;  %s3960_s15 = sphi %s4012_s15, %s4853_s15   ;;  %s3956_s14 = sphi %s4010_s14, %s4852_s14   ;;  %s3952_s13 = sphi %s4008_s13, %s4851_s13   ;;  %s3948_s12 = sphi %s4006_s12, %s4850_s12  }
   0xc   : > { %s2947_s21 = sadd.s32 4294967294, %s3976_s19   ;;  %p56_p0 = scmp.ne.s32.totalorder %s3952_s13, %s3948_s12 }
   0xd   : > { %p4050_p1 = scmp.eq.s32.totalorder %s2946_s20, 0  ;;  %p4054_p2 = scmp.eq.s32.totalorder %s2946_s20, 3 }
   0xe   : > { %p132_p3 = scmp.eq.s32.totalorder %s2947_s21, 3  ;;  %p2952_p5 = scmp.ge.s32.totalorder %s3976_s19, 1 }
   0xf   : > { %s4827_s22 = scalar_select %p4050_p1, 1, 0 }
  0x10   : > { %s4828_s23 = scalar_select %p4054_p2, 1, 0 }
  0x11   : > { %p4060_p4 = por %p4050_p1, %p56_p0  ;;  %p4065_p6 = por %p132_p3, %p56_p0 }
  0x12   : > { %p139_p7 = scmp.lt.s32.totalorder %s3976_s19, 5  ;;  %s3978_s27 = smov [#allocation6]  }
  0x13   : > { %s4829_s24 = scalar_select %p4060_p4, 1, 0 }
  0x14   : > { %s4830_s25 = scalar_select %p4065_p6, 1, 0 }
  0x15   : > { %p4070_p8 = pnand %p2952_p5, %p139_p7  ;;  %s151_s28 = sshll.u32 %s3978_s27, 4  ;;  %s152_s28 = int_to_ptr.vmem [resolvable:$true] %s151_s28 }
  0x16   : > { %s3979_s30 = smov [#allocation8]   ;;  %s4833_s1 = sld [smem:[#allocation14_spill]] }
  0x17   : > { %s4831_s26 = scalar_select %p4070_p8, 1, 0 }
  0x18   : > { %p3601_p9 = pneg %p4070_p8  ;;  %s165_s4 = sshll.u32 %s3979_s30, 4  ;;  %s4082_s4 = int_to_ptr.vmem [resolvable:$true] %s165_s4 }
  0x1a   : > { %p4078_p10 = pnand %p3601_p9, %p4050_p1 }
  0x1c   : > { %s3788_s7 = scalar_lea.hbm %s4833_s1, 9216  ;;  %p3790_p12 = pneg %p4078_p10 }
  0x1d   : > { %p3789_p11 = scmp.ne.s32.totalorder %s4833_s1, %s3788_s7  ;;  %p3795_p3 = scmp.lt.u32.totalorder %s3788_s7, %s4833_s1 }
  0x1f   : > { %p3791_p13 = pnand %p3790_p12, %p3789_p11 }
  0x21   : > { %p3792_p0 = pneg %p3791_p13 }
  0x23   : > { %p3797_p5 = pnand %p3795_p3, %p3792_p0 }
  0x25   : > { %3800 = shalt.err (!%p3797_p5)
}
  0x26   : > { %s3801_s20 = scalar_lea.vmem %s152_s28, 9216  ;;  %p3809_p1 = scmp.lt.s32.totalorder %s152_s28, %s152_s28 }
  0x27   : > { %p3802_p7 = scmp.ne.s32.totalorder %s152_s28, %s3801_s20  ;;  %p3810_p4 = scmp.lt.s32.totalorder %s3801_s20, %s3801_s20 }
  0x29   : > { %p3804_p9 = pnand %p3802_p7, %p3790_p12  ;;  %p3811_p8 = por %p3810_p4, %p3809_p1 }
  0x2b   : > { %p3805_p6 = pneg %p3804_p9 }
  0x2d   : > { %p3812_p2 = pnand %p3811_p8, %p3805_p6 }
  0x2f   : > { %3815 = shalt.err (!%p3812_p2)
}
  0x30   : > { %s4821_s21 = smov 64   ;;  %s4822_s27 = smov 4  }
  0x31   : > { %3604 = dma.hbm_to_vmem [thread:$0]  (!%p4078_p10), %s4833_s1, 9216, %s152_s28, [#allocation7], %s4821_s21, %s4821_s21, %s4822_s27  }
  0x32   : > { %s4834_s2 = sld [smem:[#allocation15_spill]] }
  0x38   : > { %s3816_s8 = scalar_lea.hbm %s4834_s2, 16 }
  0x39   : > { %p3817_p1 = scmp.ne.s32.totalorder %s4834_s2, %s3816_s8  ;;  %p3823_p6 = scmp.lt.u32.totalorder %s3816_s8, %s4834_s2 }
  0x3b   : > { %p3819_p2 = pnand %p3817_p1, %p3790_p12 }
  0x3d   : > { %p3820_p4 = pneg %p3819_p2 }
  0x3f   : > { %p3825_p8 = pnand %p3823_p6, %p3820_p4 }
  0x41   : > { %3828 = shalt.err (!%p3825_p8)
}
  0x42   : > { %s3829_s28 = scalar_lea.vmem %s4082_s4, 16  ;;  %s3836_s30 = scalar_lea.vmem %s4082_s4, 32 }
  0x43   : > { %p3830_p11 = scmp.ne.s32.totalorder %s4082_s4, %s3829_s28  ;;  %p3837_p3 = scmp.lt.s32.totalorder %s4082_s4, %s4082_s4 }
  0x44   : > { %p3838_p5 = scmp.lt.s32.totalorder %s3836_s30, %s3829_s28 }
  0x45   : > { %p3832_p13 = pnand %p3830_p11, %p3790_p12 }
  0x46   : > { %p3839_p7 = por %p3838_p5, %p3837_p3 }
  0x47   : > { %p3833_p0 = pneg %p3832_p13 }
  0x49   : > { %p3840_p9 = pnand %p3839_p7, %p3833_p0 }
  0x4b   : > { %3843 = shalt.err (!%p3840_p9)
}
  0x4c   : > { %3607 = dma.hbm_to_vmem [thread:$0]  (!%p4078_p10), %s4834_s2, 16, %s4082_s4, [#allocation7]  }
  0x4d   : > { %s29_s7 = sadd.s32 1, %s3968_s17  ;;  %s32_s8 = sadd.s32 1, %s3972_s18 }
  0x4e   : > { %p30_p12 = scmp.ge.s32.totalorder %s29_s7, 2  ;;  %s2948_s29 = sshll.u32 %s3972_s18, 1 }
  0x4f   : > { %s37_s9 = sadd.s32 %s3968_s17, %s2948_s29  ;;  %s43_s10 = sadd.s32 1, %s3956_s14 }
  0x50   : > { %s4857_s7 = smov (%p30_p12, %s29_s7), 0  ;;  %s4859_s8 = smov (!%p30_p12, %s32_s8), %s3972_s18 }
  0x51   : > { %p50_p1 = scmp.ne.s32.totalorder %s3956_s14, %s3952_s13  ;;  %p51_p2 = scmp.eq.s32.totalorder %s3976_s19, 0 }
  0x52   : > { %p34_p4 = scmp.ge.s32.totalorder %s4859_s8, 2  ;;  %p3618_p6 = scmp.lt.s32.totalorder %s3976_s19, 4 }
  0x53   : > { %p4147_p8 = por %p51_p2, %p50_p1  ;;  %p4836_p10 = scmp.ne.s32.totalorder %s4828_s23, 0 }
  0x54   : > { %s4861_s8 = smov (%p34_p4, %s4859_s8), 0  ;;  %s176_s20 = sand.u32 1, %s3956_s14  }
  0x55   : > { %p4153_p11 = por %p4836_p10, %p50_p1  ;;  %s3587_s28 = smul.u32 1920, %s37_s9 }
  0x56   : > { %s2949_s30 = sshll.u32 %s4861_s8, 1  ;;  %s3586_s6 = smul.u32 120, %s176_s20 }
  0x57   : > { %s39_s5 = sadd.s32 %s2949_s30, %s4857_s7  ;;  %s4165_s1 = scalar_lea.hbm %s4813_s0, %s3587_s28 }
  0x58   : > { %s40_s29 = ssub.s32 %s37_s9, %s39_s5  ;;  %s180_s23 = scalar_lea.vmem [#allocation3], %s3586_s6 }
  0x59   : > { %p41_p13 = scmp.eq.s32.totalorder %s40_s29, 0  ;;  %s189_s2 = sshll.u32 %s180_s23, 4  ;;  %s4178_s2 = int_to_ptr.vmem [resolvable:$true] %s189_s2 }
  0x5a   : > { %p4171_p0 = pnand %p3618_p6, %p4147_p8  ;;  %s4180_s21 = scalar_lea.sflag [#allocation4], %s176_s20 }
  0x5b   : > { %s4176_s9 = scalar_select %p41_p13, %s3956_s14, %s43_s10  }
  0x5c   : > { %s3844_s27 = scalar_lea.hbm %s4165_s1, 1920  ;;  %p3846_p5 = pneg %p4171_p0 }
  0x5d   : > { %p3845_p3 = scmp.ne.s32.totalorder %s4165_s1, %s3844_s27  ;;  %s3849_s30 = scalar_lea.hbm %s4813_s0, 7680 }
  0x5e   : > { %p3850_p12 = scmp.lt.u32.totalorder %s4165_s1, %s4813_s0  ;;  %p3851_p1 = scmp.lt.u32.totalorder %s3849_s30, %s3844_s27 }
  0x5f   : > { %p3847_p7 = pnand %p3846_p5, %p3845_p3  ;;  %p3853_p4 = scmp.lt.u32.totalorder %s3844_s27, %s4165_s1 }
  0x60   : > { %p3852_p2 = por %p3851_p1, %p3850_p12 }
  0x61   : > { %p3848_p9 = pneg %p3847_p7 }
  0x62   : > { %p3854_p6 = por %p3853_p4, %p3852_p2 }
  0x64   : > { %p3855_p8 = pnand %p3854_p6, %p3848_p9 }
  0x66   : > { %3858 = shalt.err (!%p3855_p8)
}
  0x67   : > { %s3859_s10 = scalar_lea.vmem %s4178_s2, 1920  ;;  %s3982_s20 = smov [#allocation3]  }
  0x68   : > { %p3860_p10 = scmp.ne.s32.totalorder %s4178_s2, %s3859_s10  ;;  %s3864_s29 = sshll.u32 %s3982_s20, 4  ;;  %s3865_s29 = int_to_ptr.vmem [resolvable:$false] %s3864_s29 }
  0x69   : > { %s3866_s23 = scalar_lea.vmem %s3865_s29, 3840  ;;  %p3867_p7 = scmp.lt.s32.totalorder %s4178_s2, %s3865_s29 }
  0x6a   : > { %p3862_p13 = pnand %p3860_p10, %p3846_p5  ;;  %p3868_p12 = scmp.lt.s32.totalorder %s3866_s23, %s3859_s10 }
  0x6c   : > { %p3863_p3 = pneg %p3862_p13  ;;  %p3869_p1 = por %p3868_p12, %p3867_p7 }
  0x6e   : > { %p3870_p2 = pnand %p3869_p1, %p3863_p3 }
  0x70   : > { %3873 = shalt.err (!%p3870_p2)
}
  0x71   : > { %s4839_s27 = smov 4   ;;  %s4840_s11 = smov 64  }
  0x72   : > { %3611 = dma.hbm_to_vmem [thread:$0]  (!%p4171_p0), %s4165_s1, 1920, %s4178_s2, %s4180_s21, %s4840_s11, %s4840_s11, %s4839_s27  }
  0x73   : > { %p4841_p5 = scmp.ne.s32.totalorder %s4831_s26, 0 }
  0x74   : > { %s4214_s28 = sand.u32 (!%p4841_p5), 1, %s3952_s13   ;;  %p4842_p9 = scmp.ne.s32.totalorder (!%p4841_p5), %s4829_s24, 0 }
  0x75   : > { %201 = sbr.rel (%p4841_p5) target bundleno = 537 (0x219), region = 32  ;;  %s204_s5 = scalar_lea.sflag (!%p4841_p5), [#allocation4], %s4214_s28 }
  0x76   : > { %s3588_s30 = smul.u32 (!%p4841_p5), 120, %s4214_s28 }
  0x78   : > { %s4218_s6 = scalar_lea.vmem (!%p4841_p5), [#allocation3], %s3588_s30 }
  0x7c   : > { %3935 = dma.done.wait (%p4842_p9), %s204_s5, 1920  }
  0x7d   : > { %3937 = vsyncadd (%p4842_p9), %s204_s5, 4294965376  ;;  %p4843_p0 = scmp.ne.s32.totalorder %s4827_s22, 0 }
  0x7f   : > { %3939 = dma.done.wait (%p4843_p0), [#allocation7], 9232  }
  0x80   : > { %3941 = vsyncadd (%p4843_p0), [#allocation7], 4294958064  ;;  %v3692_v0 = vld [vmem:[#allocation6 + $0x40] sm:$0xff]   ;;  %v3696_v4 = vld [vmem:[#allocation6 + $0x48] sm:$0xff]   ;;  %vm339_vm0 = vsmask.f32 3328 }
  0x81   : > { %v3693_v1 = vld [vmem:[#allocation6 + $0xc0] sm:$0xff]   ;;  %3266 = vmatprep.subr.bf16.mxu0 %v3692_v0  ;;  %v3697_v5 = vld [vmem:[#allocation6 + $0xc8] sm:$0xff]   ;;  %v3700_v8 = vld [vmem:[#allocation6 + $0x50] sm:$0xff]   ;;  %vm340_vm1 = vsmask.f32 7440  ;;  %vm622_vm2 = vcmask 1042432  }
  0x82   : > { %v3694_v2 = vld [vmem:[#allocation6] sm:$0xff]   ;;  %3330 = vmatprep.subr.bf16.mxu1 %v3693_v1  ;;  %v3698_v6 = vld [vmem:[#allocation6 + $0x8] sm:$0xff]   ;;  %v3701_v9 = vld [vmem:[#allocation6 + $0xd0] sm:$0xff]   ;;  %vm623_vm3 = vcmask 1046532   ;;  %s2961_s1 = sshll.u32 %s4214_s28, 7  ;;  %s3260_s18 = sshll.u32 %s3964_s16, 1 }
  0x83   : > { %v3695_v3 = vld [vmem:[#allocation6 + $0x80] sm:$0xff]   ;;  %3267 = vmatpush3.bf16.msra.mxu0 %v3694_v2  ;;  %v3699_v7 = vld [vmem:[#allocation6 + $0x88] sm:$0xff]   ;;  %v3702_v10 = vld [vmem:[#allocation6 + $0x10] sm:$0xff]   ;;  %s4724_s2 = scalar_lea.vmem [#allocation9], %s2961_s1  ;;  %s2832_s22 = sadd.s32 %s3960_s15, %s3260_s18 }
  0x84   : > { %3331 = vmatpush3.bf16.msra.mxu1 %v3695_v3  ;;  %3268 = vmatprep.subr.bf16.mxu0 %v3696_v4  ;;  %v3703_v11 = vld [vmem:[#allocation6 + $0x90] sm:$0xff]   ;;  %v3704_v12 = vld [vmem:[#allocation6 + $0x58] sm:$0xff]   ;;  %v3708_v16 = vld [vmem:[#allocation6 + $0x60] sm:$0xff]   ;;  %s3265_s16 = sshll.u32 %s2832_s22, 11  ;;  %s2839_s24 = sshll.u32 %s4724_s2, 4  ;;  %s4753_s24 = int_to_ptr.vmem [resolvable:$true] %s2839_s24 }
  0x85   : > { %3332 = vmatprep.subr.bf16.mxu1 %v3697_v5  ;;  %v3705_v13 = vld [vmem:[#allocation6 + $0xd8] sm:$0xff]   ;;  %v3709_v17 = vld [vmem:[#allocation6 + $0xe0] sm:$0xff]   ;;  %v3712_v20 = vld [vmem:[#allocation6 + $0x68] sm:$0xff]   ;;  %s4751_s21 = scalar_lea.hbm %s4816_s3, %s3265_s16  ;;  %s2824_s10 = scalar_lea.sflag [#allocation5], %s4214_s28 }
  0x86   : > { %v3706_v14 = vld [vmem:[#allocation6 + $0x18] sm:$0xff]   ;;  %v3710_v18 = vld [vmem:[#allocation6 + $0x20] sm:$0xff]   ;;  %v3713_v21 = vld [vmem:[#allocation6 + $0xe8] sm:$0xff]   ;;  %s3874_s20 = scalar_lea.vmem %s4753_s24, 2048  ;;  %s3983_s29 = smov [#allocation9]  }
  0x87   : > { %3269 = vmatpush3.bf16.msra.mxu0 %v3698_v6  ;;  %v3707_v15 = vld [vmem:[#allocation6 + $0x98] sm:$0xff]   ;;  %v3711_v19 = vld [vmem:[#allocation6 + $0xa0] sm:$0xff]   ;;  %v3714_v22 = vld [vmem:[#allocation6 + $0x28] sm:$0xff]   ;;  %p3875_p4 = scmp.ne.s32.totalorder %s4753_s24, %s3874_s20  ;;  %s3878_s23 = sshll.u32 %s3983_s29, 4  ;;  %s3879_s23 = int_to_ptr.vmem [resolvable:$false] %s3878_s23 }
  0x88   : > { %3333 = vmatpush3.bf16.msra.mxu1 %v3699_v7  ;;  %3270 = vmatprep.subr.bf16.mxu0 %v3700_v8  ;;  %v3715_v23 = vld [vmem:[#allocation6 + $0xa8] sm:$0xff]   ;;  %v3716_v24 = vld [vmem:[#allocation6 + $0x70] sm:$0xff]   ;;  %v3720_v28 = vld [vmem:[#allocation6 + $0x78] sm:$0xff]   ;;  %s3880_s27 = scalar_lea.vmem %s3879_s23, 4096  ;;  %p3881_p10 = scmp.lt.s32.totalorder %s4753_s24, %s3879_s23 }
  0x89   : > { %3334 = vmatprep.subr.bf16.mxu1 %v3701_v9  ;;  %v3717_v25 = vld [vmem:[#allocation6 + $0xf0] sm:$0xff]   ;;  %v3721_v29 = vld [vmem:[#allocation6 + $0xf8] sm:$0xff]   ;;  %vm4236_vm4 = vmor %vm622_vm2, %vm623_vm3  ;;  %p3876_p6 = pnand %p3875_p4, %p4153_p11  ;;  %p3882_p13 = scmp.lt.s32.totalorder %s3880_s27, %s3874_s20 }
  0x8a   : > { %v3718_v26 = vld [vmem:[#allocation6 + $0x30] sm:$0xff]   ;;  %v3722_v30 = vld [vmem:[#allocation6 + $0x38] sm:$0xff]   ;;  %vm4242_vm5 = vmor %vm339_vm0, %vm340_vm1 }
  0x8b   : > { %3271 = vmatpush3.bf16.msra.mxu0 %v3702_v10  ;;  %v3719_v27 = vld [vmem:[#allocation6 + $0xb0] sm:$0xff]   ;;  %v3723_v31 = vld [vmem:[#allocation6 + $0xb8] sm:$0xff]   ;;  %v3726_v56 = vld [vmem:[#allocation6 + $0x140] sm:$0xff]   ;;  %p3877_p8 = pneg %p3876_p6  ;;  %p3883_p3 = por %p3882_p13, %p3881_p10 }
  0x8c   : > { %3335 = vmatpush3.bf16.msra.mxu1 %v3703_v11  ;;  %3272 = vmatprep.subr.bf16.mxu0 %v3704_v12  ;;  %v315_v32 = vld [vmem:[%s4218_s6] sm:$0xf]  ;;  %v316_v33 = vld [vmem:[%s4218_s6 + $0x4] sm:$0xf]  ;;  %v317_v34 = vld [vmem:[%s4218_s6 + $0x8] sm:$0x1] }
  0x8d   : > { %3336 = vmatprep.subr.bf16.mxu1 %v3705_v13  ;;  %v343_v35 = vshrl.u32 %v315_v32, 16  ;;  %v346_v36 = vshll.u32 %v315_v32, 16  ;;  %v352_v37 = vshll.u32 %v316_v33, 16  ;;  %v356_v38 = vshrl.u32 %v316_v33, 16  ;;  %v3724_v40 = vld [vmem:[%s4218_s6 + $0xc] sm:$0xff]   ;;  %v3725_v59 = vld [vmem:[%s4218_s6] sm:$0xff]   ;;  %p3884_p7 = pnand %p3883_p3, %p3877_p8 }
  0x8e   : > { %v362_v39 = vshll.u32 %v317_v34, 16  ;;  %2451 = vmatprep.mubr.bf16.mxu1 %v3724_v40  ;;  %v574_v46 = vld [vmem:[%s4218_s6] sm:$0xe]  ;;  %v575_v47 = vld [vmem:[%s4218_s6 + $0x4] sm:$0xf]  ;;  %v3727_v62 = vld [vmem:[#allocation6 + $0x1c0] sm:$0xff]  }
  0x8f   : > { %3273 = vmatpush3.bf16.msra.mxu0 %v3706_v14  ;;  %v345_v41 = vrot.slane %v343_v35, 4  ;;  %v348_v42 = vrot.slane %v346_v36, 5  ;;  %v354_v43 = vrot.slane %v352_v37, 5  ;;  %v358_v44 = vrot.slane %v356_v38, 4  ;;  %v576_v52 = vld [vmem:[%s4218_s6 + $0x8] sm:$0x1] }
  0x90   : > { %3337 = vmatpush3.bf16.msra.mxu1 %v3707_v15  ;;  %3274 = vmatprep.subr.bf16.mxu0 %v3708_v16  ;;  %v364_v45 = vrot.slane %v362_v39, 5  ;;  %v2978_v53 = vrot.slane %v574_v46, 9  ;;  %v627_v54 = vrot.slane %v575_v47, 5  ;;  %v630_v55 = vrot.slane %v576_v52, 5  ;;  %v3728_v63 = vld [vmem:[#allocation6 + $0x100] sm:$0xff]   ;;  %v3733_v34 = vld [vmem:[#allocation6 + $0x1c8] sm:$0xff]  }
  0x91   : > { %3338 = vmatprep.subr.bf16.mxu1 %v3709_v17  ;;  %v349_v50 = vor.u32 %v348_v42, %v345_v41  ;;  %v359_v51 = vor.u32 %v358_v44, %v354_v43  ;;  %v3729_v3 = vld [vmem:[#allocation6 + $0x180] sm:$0xff]   ;;  %v318_v6 = vld [vmem:[%s4218_s6 + $0xc] sm:$0xf]  ;;  %v3734_v35 = vld [vmem:[#allocation6 + $0x108] sm:$0xff]  }
  0x92   : > { %v628_v60 = vsel %vm4236_vm4, %v2978_v53, %v627_v54  ;;  %v629_v61 = vrot.slane %v627_v54, 4  ;;  %v319_v7 = vld [vmem:[%s4218_s6 + $0x10] sm:$0xf]  ;;  %v320_v8 = vld [vmem:[%s4218_s6 + $0x14] sm:$0x1]  ;;  %v367_v9 = vshrl.u32 %v318_v6, 16 }
  0x93   : > { %3275 = vmatpush3.bf16.msra.mxu0 %v3710_v18  ;;  %v350_v57 = vrot.slane %v349_v50, 4  ;;  %v360_v58 = vrot.slane %v359_v51, 4  ;;  %v370_v10 = vshll.u32 %v318_v6, 16  ;;  %v376_v11 = vshll.u32 %v319_v7, 16  ;;  %v3730_v14 = vld [vmem:[%s4218_s6 + $0x18] sm:$0xff]   ;;  %v3736_v52 = vld [vmem:[%s4218_s6 + $0x24] sm:$0xff]  }
  0x94   : > { %3339 = vmatpush3.bf16.msra.mxu1 %v3711_v19  ;;  %3276 = vmatprep.subr.bf16.mxu0 %v3712_v20  ;;  %v631_v2 = vsel %vm4236_vm4, %v629_v61, %v630_v55  ;;  %v380_v12 = vshrl.u32 %v319_v7, 16  ;;  %v386_v13 = vshll.u32 %v320_v8, 16  ;;  %v369_v15 = vrot.slane %v367_v9, 4  ;;  %v577_v20 = vld [vmem:[%s4218_s6 + $0xc] sm:$0xe]  ;;  %v3735_v39 = vld [vmem:[#allocation6 + $0x188] sm:$0xff]  }
  0x95   : > { %3340 = vmatprep.subr.bf16.mxu1 %v3713_v21  ;;  %v355_v0 = vsel %vm4242_vm5, %v350_v57, %v354_v43  ;;  %v365_v1 = vsel %vm4242_vm5, %v360_v58, %v364_v45  ;;  %v2986_v5 = vcombine.low %v628_v60, %v631_v2  ;;  %v372_v16 = vrot.slane %v370_v10, 5  ;;  %v578_v21 = vld [vmem:[%s4218_s6 + $0x10] sm:$0xf]  ;;  %v321_v42 = vld [vmem:[%s4218_s6 + $0x18] sm:$0xf]  ;;  %v3738_v2 = vld [vmem:[#allocation6 + $0x150] sm:$0xff]  }
  0x96   : > { %v2970_v4 = vcombine.low %v355_v0, %v365_v1  ;;  %v378_v17 = vrot.slane %v376_v11, 5  ;;  %v382_v18 = vrot.slane %v380_v12, 4  ;;  %v388_v19 = vrot.slane %v386_v13, 5  ;;  %v322_v43 = vld [vmem:[%s4218_s6 + $0x1c] sm:$0xf]  ;;  %v3739_v8 = vld [vmem:[#allocation6 + $0x1d0] sm:$0xff]  }
  0x97   : > { %3277 = vmatpush3.bf16.msra.mxu0 %v3714_v22  ;;  %v373_v22 = vor.u32 %v372_v16, %v369_v15  ;;  %v323_v44 = vld [vmem:[%s4218_s6 + $0x20] sm:$0x1]  ;;  %v391_v45 = vshrl.u32 %v321_v42, 16  ;;  %v394_v46 = vshll.u32 %v321_v42, 16  ;;  %v400_v47 = vshll.u32 %v322_v43, 16 }
  0x98   : > { %3341 = vmatpush3.bf16.msra.mxu1 %v3715_v23  ;;  %3278 = vmatprep.subr.bf16.mxu0 %v3716_v24  ;;  %v383_v23 = vor.u32 %v382_v18, %v378_v17  ;;  %v579_v24 = vld [vmem:[%s4218_s6 + $0x14] sm:$0x1]  ;;  %v404_v50 = vshrl.u32 %v322_v43, 16  ;;  %v410_v51 = vshll.u32 %v323_v44, 16  ;;  %v580_v58 = vld [vmem:[%s4218_s6 + $0x18] sm:$0xe] }
  0x99   : > { %3342 = vmatprep.subr.bf16.mxu1 %v3717_v25  ;;  %2354 = vmatprep.mubr.bf16.mxu0 %v2970_v4  ;;  %v2979_v25 = vrot.slane %v577_v20, 9  ;;  %v393_v53 = vrot.slane %v391_v45, 4  ;;  %v396_v54 = vrot.slane %v394_v46, 5  ;;  %v402_v55 = vrot.slane %v400_v47, 5  ;;  %v3740_v9 = vld [vmem:[#allocation6 + $0x110] sm:$0xff]   ;;  %v3745_v44 = vld [vmem:[#allocation6 + $0x1d8] sm:$0xff]  }
  0x9a   : > { %v412_v57 = vrot.slane %v410_v51, 5  ;;  %v3741_v13 = vld [vmem:[#allocation6 + $0x190] sm:$0xff]   ;;  %v3746_v45 = vld [vmem:[#allocation6 + $0x118] sm:$0xff]  }
  0x9b   : > { %3279 = vmatpush3.bf16.msra.mxu0 %v3718_v26  ;;  %v634_v26 = vrot.slane %v578_v21, 5  ;;  %v397_v60 = vor.u32 %v396_v54, %v393_v53  ;;  %v324_v16 = vld [vmem:[%s4218_s6 + $0x24] sm:$0xf]  ;;  %v326_v18 = vld [vmem:[%s4218_s6 + $0x2c] sm:$0x1] }
  0x9c   : > { %3343 = vmatpush3.bf16.msra.mxu1 %v3719_v27  ;;  %3280 = vmatprep.subr.bf16.mxu0 %v3720_v28  ;;  %v637_v27 = vrot.slane %v579_v24, 5  ;;  %v3732_v28 = vld [vmem:[#allocation6 + $0x148] sm:$0xff]   ;;  %v418_v20 = vshll.u32 %v324_v16, 16  ;;  %v3742_v24 = vld [vmem:[%s4218_s6 + $0x30] sm:$0xff]  }
  0x9d   : > { %3344 = vmatprep.subr.bf16.mxu1 %v3721_v29  ;;  %v374_v29 = vrot.slane %v373_v22, 4  ;;  %v635_v32 = vsel %vm4236_vm4, %v2979_v25, %v634_v26  ;;  %v636_v33 = vrot.slane %v634_v26, 4  ;;  %v3747_v51 = vld [vmem:[#allocation6 + $0x198] sm:$0xff]  }
  0x9e   : > { %v420_v26 = vrot.slane %v418_v20, 5  ;;  %v327_v54 = vld [vmem:[%s4218_s6 + $0x30] sm:$0xf] }
  0x9f   : > { %3281 = vmatpush3.bf16.msra.mxu0 %v3722_v30  ;;  %v384_v30 = vrot.slane %v383_v23, 4  ;;  %v379_v36 = vsel %vm4242_vm5, %v374_v29, %v378_v17  ;;  %v638_v38 = vsel %vm4236_vm4, %v636_v33, %v637_v27  ;;  %v325_v17 = vld [vmem:[%s4218_s6 + $0x28] sm:$0xf]  ;;  %v434_v23 = vshll.u32 %v326_v18, 16  ;;  %v3751_v18 = vld [vmem:[#allocation6 + $0x1e0] sm:$0xff]  }
  0xa0   : > { %3345 = vmatpush3.bf16.msra.mxu1 %v3723_v31  ;;  %3394 = vmatprep.subr.bf16.mxu0 %v3726_v56  ;;  %v3731_v31 = vld [vmem:[%s4218_s6 + $0xc] sm:$0xff]   ;;  %v2987_v41 = vcombine.low %v635_v32, %v638_v38  ;;  %v406_v56 = vrot.slane %v404_v50, 4  ;;  %v424_v21 = vshll.u32 %v325_v17, 16  ;;  %v428_v22 = vshrl.u32 %v325_v17, 16 }
  0xa1   : > { %3458 = vmatprep.subr.bf16.mxu1 %v3727_v62  ;;  %v389_v37 = vsel %vm4242_vm5, %v384_v30, %v388_v19  ;;  %v582_v62 = vld [vmem:[%s4218_s6 + $0x20] sm:$0x1]  ;;  %v415_v19 = vshrl.u32 %v324_v16, 16  ;;  %v436_v29 = vrot.slane %v434_v23, 5  ;;  %v583_v30 = vld [vmem:[%s4218_s6 + $0x24] sm:$0xe] }
  0xa2   : > { %2355 = vmatmul.mubr.bf16.vlgmr.msra.gmra.mrb[0].mxu0 %v3725_v59  ;;  %v2971_v40 = vcombine.low %v379_v36, %v389_v37  ;;  %v581_v59 = vld [vmem:[%s4218_s6 + $0x1c] sm:$0xf]  ;;  %v407_v61 = vor.u32 %v406_v56, %v402_v55  ;;  %v644_v1 = vrot.slane %v582_v62, 5  ;;  %v426_v27 = vrot.slane %v424_v21, 5  ;;  %v3744_v38 = vld [vmem:[#allocation6 + $0x158] sm:$0xff]  }
  0xa3   : > { %2452 = vmatmul.mubr.bf16.vlgmr.msra.gmra.mrb[0].mxu1 %v2986_v5  ;;  %3395 = vmatpush3.bf16.msra.mxu0 %v3728_v63  ;;  %v2980_v63 = vrot.slane %v580_v58, 9  ;;  %v641_v0 = vrot.slane %v581_v59, 5  ;;  %v3737_v5 = vld [vmem:[%s4218_s6 + $0x18] sm:$0xff]   ;;  %v417_v25 = vrot.slane %v415_v19, 4  ;;  %v442_v58 = vshll.u32 %v327_v54, 16 }
  0xa4   : > { %3459 = vmatpush3.bf16.msra.mxu1 %v3729_v3  ;;  %2459 = vmatprep.mubr.bf16.mxu1 %v3730_v14  ;;  %v398_v3 = vrot.slane %v397_v60, 4  ;;  %v408_v4 = vrot.slane %v407_v61, 4  ;;  %v329_v56 = vld [vmem:[%s4218_s6 + $0x38] sm:$0x1]  ;;  %v3748_v62 = vld [vmem:[%s4218_s6 + $0x3c] sm:$0xff]  }
  0xa5   : > { %3396 = vmatprep.subr.bf16.mxu0 %v3732_v28  ;;  %3460 = vmatprep.subr.bf16.mxu1 %v3733_v34  ;;  %v642_v6 = vsel %vm4236_vm4, %v2980_v63, %v641_v0  ;;  %v643_v7 = vrot.slane %v641_v0, 4  ;;  %v430_v28 = vrot.slane %v428_v22, 4  ;;  %v421_v32 = vor.u32 %v420_v26, %v417_v25  ;;  %v585_v34 = vld [vmem:[%s4218_s6 + $0x2c] sm:$0x1]  ;;  %v3752_v19 = vld [vmem:[#allocation6 + $0x120] sm:$0xff]  }
  0xa6   : > { %2362 = vmatprep.mubr.bf16.mxu0 %v2971_v40  ;;  %v403_v10 = vsel %vm4242_vm5, %v398_v3, %v402_v55  ;;  %v413_v11 = vsel %vm4242_vm5, %v408_v4, %v412_v57  ;;  %v651_v37 = vrot.slane %v585_v34, 5  ;;  %v328_v55 = vld [vmem:[%s4218_s6 + $0x34] sm:$0xf]  ;;  %v439_v57 = vshrl.u32 %v327_v54, 16  ;;  %v586_v4 = vld [vmem:[%s4218_s6 + $0x30] sm:$0xe] }
  0xa7   : > { %3397 = vmatpush3.bf16.msra.mxu0 %v3734_v35  ;;  %v645_v12 = vsel %vm4236_vm4, %v643_v7, %v644_v1  ;;  %v2972_v14 = vcombine.low %v403_v10, %v413_v11  ;;  %v431_v33 = vor.u32 %v430_v28, %v426_v27  ;;  %v2981_v35 = vrot.slane %v583_v30, 9  ;;  %v3753_v23 = vld [vmem:[#allocation6 + $0x1a0] sm:$0xff]   ;;  %v332_v28 = vld [vmem:[%s4218_s6 + $0x44] sm:$0x1]  ;;  %v3754_v34 = vld [vmem:[%s4218_s6 + $0x48] sm:$0xff]  }
  0xa8   : > { %3461 = vmatpush3.bf16.msra.mxu1 %v3735_v39  ;;  %3398 = vmatprep.subr.bf16.mxu0 %v3738_v2  ;;  %v2988_v15 = vcombine.low %v642_v6, %v645_v12  ;;  %v422_v39 = vrot.slane %v421_v32, 4  ;;  %v448_v59 = vshll.u32 %v328_v55, 16  ;;  %v452_v60 = vshrl.u32 %v328_v55, 16  ;;  %v3750_v12 = vld [vmem:[#allocation6 + $0x160] sm:$0xff]  }
  0xa9   : > { %3462 = vmatprep.subr.bf16.mxu1 %v3739_v8  ;;  %v432_v40 = vrot.slane %v431_v33, 4  ;;  %v458_v61 = vshll.u32 %v329_v56, 16  ;;  %v441_v63 = vrot.slane %v439_v57, 4  ;;  %v444_v0 = vrot.slane %v442_v58, 5  ;;  %v588_v8 = vld [vmem:[%s4218_s6 + $0x38] sm:$0x1] }
  0xaa   : > { %2363 = vmatmul.mubr.bf16.gmra.mrb[4].mxu0 %v3731_v31  ;;  %v584_v31 = vld [vmem:[%s4218_s6 + $0x28] sm:$0xf]  ;;  %v427_v46 = vsel %vm4242_vm5, %v422_v39, %v426_v27  ;;  %v450_v1 = vrot.slane %v448_v59, 5  ;;  %v454_v2 = vrot.slane %v452_v60, 4  ;;  %v658_v11 = vrot.slane %v588_v8, 5  ;;  %v3757_v56 = vld [vmem:[#allocation6 + $0x1e8] sm:$0xff]  }
  0xab   : > { %2460 = vmatmul.mubr.bf16.gmra.mrb[4].mxu1 %v2987_v41  ;;  %3399 = vmatpush3.bf16.msra.mxu0 %v3740_v9  ;;  %v648_v36 = vrot.slane %v584_v31, 5  ;;  %v3743_v41 = vld [vmem:[%s4218_s6 + $0x24] sm:$0xff]   ;;  %v437_v47 = vsel %vm4242_vm5, %v432_v40, %v436_v29  ;;  %v460_v3 = vrot.slane %v458_v61, 5  ;;  %v445_v6 = vor.u32 %v444_v0, %v441_v63  ;;  %v330_v26 = vld [vmem:[%s4218_s6 + $0x3c] sm:$0xf]  ;;  %v3760_v8 = vld [vmem:[%s4218_s6 + $0x54] sm:$0xff]  }
  0xac   : > { %2467 = vmatprep.mubr.bf16.mxu1 %v3736_v52  ;;  %3463 = vmatpush3.bf16.msra.mxu1 %v3741_v13  ;;  %v2973_v52 = vcombine.low %v427_v46, %v437_v47  ;;  %v455_v7 = vor.u32 %v454_v2, %v450_v1  ;;  %v2982_v9 = vrot.slane %v586_v4, 9  ;;  %v331_v27 = vld [vmem:[%s4218_s6 + $0x40] sm:$0xf]  ;;  %v463_v29 = vshrl.u32 %v330_v26, 16  ;;  %v589_v40 = vld [vmem:[%s4218_s6 + $0x3c] sm:$0xe] }
  0xad   : > { %2370 = vmatprep.mubr.bf16.mxu0 %v2972_v14  ;;  %v649_v42 = vsel %vm4236_vm4, %v2981_v35, %v648_v36  ;;  %v650_v43 = vrot.slane %v648_v36, 4  ;;  %3400 = vmatprep.subr.bf16.mxu0 %v3744_v38  ;;  %v446_v13 = vrot.slane %v445_v6, 4  ;;  %v466_v30 = vshll.u32 %v330_v26, 16  ;;  %v3758_v57 = vld [vmem:[#allocation6 + $0x128] sm:$0xff]   ;;  %v333_v0 = vld [vmem:[%s4218_s6 + $0x48] sm:$0xf] }
  0xae   : > { %3464 = vmatprep.subr.bf16.mxu1 %v3745_v44  ;;  %v456_v14 = vrot.slane %v455_v7, 4  ;;  %v472_v31 = vshll.u32 %v331_v27, 16  ;;  %v476_v32 = vshrl.u32 %v331_v27, 16  ;;  %v482_v33 = vshll.u32 %v332_v28, 16  ;;  %v591_v44 = vld [vmem:[%s4218_s6 + $0x44] sm:$0x1] }
  0xaf   : > { %v652_v50 = vsel %vm4236_vm4, %v650_v43, %v651_v37  ;;  %3401 = vmatpush3.bf16.msra.mxu0 %v3746_v45  ;;  %v451_v20 = vsel %vm4242_vm5, %v446_v13, %v450_v1  ;;  %v465_v35 = vrot.slane %v463_v29, 4  ;;  %v468_v36 = vrot.slane %v466_v30, 5  ;;  %v3759_v61 = vld [vmem:[#allocation6 + $0x1a8] sm:$0xff]   ;;  %v334_v1 = vld [vmem:[%s4218_s6 + $0x4c] sm:$0xf] }
  0xb0   : > { %v2989_v53 = vcombine.low %v649_v42, %v652_v50  ;;  %3465 = vmatpush3.bf16.msra.mxu1 %v3747_v51  ;;  %3402 = vmatprep.subr.bf16.mxu0 %v3750_v12  ;;  %v461_v21 = vsel %vm4242_vm5, %v456_v14, %v460_v3  ;;  %v474_v37 = vrot.slane %v472_v31, 5  ;;  %v478_v38 = vrot.slane %v476_v32, 4  ;;  %v3756_v50 = vld [vmem:[#allocation6 + $0x168] sm:$0xff]   ;;  %v335_v2 = vld [vmem:[%s4218_s6 + $0x50] sm:$0x1]  ;;  %v3763_v28 = vld [vmem:[#allocation6 + $0x1f0] sm:$0xff]  }
  0xb1   : > { %3466 = vmatprep.subr.bf16.mxu1 %v3751_v18  ;;  %v484_v39 = vrot.slane %v482_v33, 5  ;;  %v469_v42 = vor.u32 %v468_v36, %v465_v35  ;;  %v2983_v45 = vrot.slane %v589_v40, 9  ;;  %v665_v47 = vrot.slane %v591_v44, 5  ;;  %v592_v14 = vld [vmem:[%s4218_s6 + $0x48] sm:$0xe]  ;;  %v3766_v44 = vld [vmem:[%s4218_s6 + $0x60] sm:$0xff]  }
  0xb2   : > { %2371 = vmatmul.mubr.bf16.gmra.mrb[8].mxu0 %v3737_v5  ;;  %v587_v5 = vld [vmem:[%s4218_s6 + $0x34] sm:$0xf]  ;;  %v479_v43 = vor.u32 %v478_v38, %v474_v37  ;;  %v487_v3 = vshrl.u32 %v333_v0, 16  ;;  %v490_v4 = vshll.u32 %v333_v0, 16  ;;  %v500_v6 = vshrl.u32 %v334_v1, 16  ;;  %v3764_v29 = vld [vmem:[#allocation6 + $0x130] sm:$0xff]  }
  0xb3   : > { %2468 = vmatmul.mubr.bf16.gmra.mrb[8].mxu1 %v2988_v15  ;;  %2378 = vmatprep.mubr.bf16.mxu0 %v2973_v52  ;;  %v655_v10 = vrot.slane %v587_v5, 5  ;;  %v3749_v15 = vld [vmem:[%s4218_s6 + $0x30] sm:$0xff]   ;;  %v470_v51 = vrot.slane %v469_v42, 4  ;;  %v496_v5 = vshll.u32 %v334_v1, 16  ;;  %v506_v7 = vshll.u32 %v335_v2, 16  ;;  %v3765_v33 = vld [vmem:[#allocation6 + $0x1b0] sm:$0xff]  }
  0xb4   : > { %2475 = vmatprep.mubr.bf16.mxu1 %v3742_v24  ;;  %v2974_v24 = vcombine.low %v451_v20, %v461_v21  ;;  %3403 = vmatpush3.bf16.msra.mxu0 %v3752_v19  ;;  %v480_v52 = vrot.slane %v479_v43, 4  ;;  %v502_v12 = vrot.slane %v500_v6, 4  ;;  %v594_v18 = vld [vmem:[%s4218_s6 + $0x50] sm:$0x1]  ;;  %v2984_v19 = vrot.slane %v592_v14, 9 }
  0xb5   : > { %v656_v16 = vsel %vm4236_vm4, %v2982_v9, %v655_v10  ;;  %v657_v17 = vrot.slane %v655_v10, 4  ;;  %3467 = vmatpush3.bf16.msra.mxu1 %v3753_v23  ;;  %3404 = vmatprep.subr.bf16.mxu0 %v3756_v50  ;;  %v475_v58 = vsel %vm4242_vm5, %v470_v51, %v474_v37  ;;  %v489_v9 = vrot.slane %v487_v3, 4  ;;  %v336_v36 = vld [vmem:[%s4218_s6 + $0x54] sm:$0xf]  ;;  %v337_v37 = vld [vmem:[%s4218_s6 + $0x58] sm:$0xf] }
  0xb6   : > { %v485_v59 = vsel %vm4242_vm5, %v480_v52, %v484_v39  ;;  %3468 = vmatprep.subr.bf16.mxu1 %v3757_v56  ;;  %v492_v10 = vrot.slane %v490_v4, 5  ;;  %v508_v13 = vrot.slane %v506_v7, 5  ;;  %v672_v21 = vrot.slane %v594_v18, 5  ;;  %v338_v38 = vld [vmem:[%s4218_s6 + $0x5c] sm:$0x1]  ;;  %v3769_v2 = vld [vmem:[#allocation6 + $0x1f8] sm:$0xff]  }
  0xb7   : > { %v659_v22 = vsel %vm4236_vm4, %v657_v17, %v658_v11  ;;  %v498_v11 = vrot.slane %v496_v5, 5  ;;  %v511_v39 = vshrl.u32 %v336_v36, 16  ;;  %v514_v40 = vshll.u32 %v336_v36, 16  ;;  %v595_v52 = vld [vmem:[%s4218_s6 + $0x54] sm:$0xe] }
  0xb8   : > { %v2990_v25 = vcombine.low %v656_v16, %v659_v22  ;;  %3405 = vmatpush3.bf16.msra.mxu0 %v3758_v57  ;;  %v493_v16 = vor.u32 %v492_v10, %v489_v9  ;;  %v3762_v22 = vld [vmem:[#allocation6 + $0x170] sm:$0xff]   ;;  %v524_v42 = vshrl.u32 %v337_v37, 16  ;;  %v530_v43 = vshll.u32 %v338_v38, 16  ;;  %v597_v56 = vld [vmem:[%s4218_s6 + $0x5c] sm:$0x1]  ;;  %v3770_v3 = vld [vmem:[#allocation6 + $0x138] sm:$0xff]  }
  0xb9   : > { %3469 = vmatpush3.bf16.msra.mxu1 %v3759_v61  ;;  %v503_v17 = vor.u32 %v502_v12, %v498_v11  ;;  %3406 = vmatprep.subr.bf16.mxu0 %v3762_v22  ;;  %v2985_v57 = vrot.slane %v595_v52, 9  ;;  %v3771_v7 = vld [vmem:[#allocation6 + $0x1b8] sm:$0xff]   ;;  %v3116_v18 = vld [vmem:[%s4218_s6 + $0x20] sm:$0x1] }
  0xba   : > { %2379 = vmatmul.mubr.bf16.gmra.mrb[12].mxu0 %v3743_v41  ;;  %v590_v41 = vld [vmem:[%s4218_s6 + $0x40] sm:$0xf]  ;;  %v494_v23 = vrot.slane %v493_v16, 4  ;;  %3470 = vmatprep.subr.bf16.mxu1 %v3763_v28  ;;  %v526_v50 = vrot.slane %v524_v42, 4  ;;  %v532_v51 = vrot.slane %v530_v43, 5 }
  0xbb   : > { %2476 = vmatmul.mubr.bf16.gmra.mrb[12].mxu1 %v2989_v53  ;;  %2386 = vmatprep.mubr.bf16.mxu0 %v2974_v24  ;;  %v662_v46 = vrot.slane %v590_v41, 5  ;;  %v3755_v53 = vld [vmem:[%s4218_s6 + $0x3c] sm:$0xff]   ;;  %v504_v24 = vrot.slane %v503_v17, 4  ;;  %v520_v41 = vshll.u32 %v337_v37, 16  ;;  %v3050_v10 = vld [vmem:[%s4218_s6 + $0xc] sm:$0xe] }
  0xbc   : > { %2483 = vmatprep.mubr.bf16.mxu1 %v3748_v62  ;;  %v2975_v62 = vcombine.low %v475_v58, %v485_v59  ;;  %v499_v30 = vsel %vm4242_vm5, %v494_v23, %v498_v11  ;;  %3407 = vmatpush3.bf16.msra.mxu0 %v3764_v29  ;;  %v679_v59 = vrot.slane %v597_v56, 5  ;;  %v3051_v11 = vld [vmem:[%s4218_s6 + $0x10] sm:$0xf]  ;;  %v3052_v12 = vld [vmem:[%s4218_s6 + $0x14] sm:$0x1]  ;;  %v1311_v29 = vshll.u32 %v3116_v18, 16 }
  0xbd   : > { %v663_v54 = vsel %vm4236_vm4, %v2983_v45, %v662_v46  ;;  %v664_v55 = vrot.slane %v662_v46, 4  ;;  %v509_v31 = vsel %vm4242_vm5, %v504_v24, %v508_v13  ;;  %3471 = vmatpush3.bf16.msra.mxu1 %v3765_v33  ;;  %v513_v45 = vrot.slane %v511_v39, 4  ;;  %v3114_v16 = vld [vmem:[%s4218_s6 + $0x18] sm:$0xf]  ;;  %v3115_v17 = vld [vmem:[%s4218_s6 + $0x1c] sm:$0xf] }
  0xbe   : > { %v516_v46 = vrot.slane %v514_v40, 5  ;;  %3472 = vmatprep.subr.bf16.mxu1 %v3769_v2  ;;  %v3074_v13 = vrot.slane %v3050_v10, 9  ;;  %v1100_v14 = vrot.slane %v3051_v11, 5  ;;  %v1301_v23 = vshll.u32 %v3115_v17, 16  ;;  %v3118_v2 = vld [vmem:[%s4218_s6 + $0x28] sm:$0xf] }
  0xbf   : > { %v666_v60 = vsel %vm4236_vm4, %v664_v55, %v665_v47  ;;  %v522_v47 = vrot.slane %v520_v41, 5  ;;  %v1305_v24 = vshrl.u32 %v3115_v17, 16  ;;  %v1313_v39 = vrot.slane %v1311_v29, 5 }
  0xc0   : > { %v2991_v63 = vcombine.low %v663_v54, %v666_v60  ;;  %v517_v54 = vor.u32 %v516_v46, %v513_v45  ;;  %v3768_v60 = vld [vmem:[#allocation6 + $0x178] sm:$0xff]   ;;  %v1102_v22 = vrot.slane %v1100_v14, 4  ;;  %v1303_v33 = vrot.slane %v1301_v23, 5 }
  0xc1   : > { %v527_v55 = vor.u32 %v526_v50, %v522_v47  ;;  %3408 = vmatprep.subr.bf16.mxu0 %v3768_v60  ;;  %3473 = vmatpush3.bf16.msra.mxu1 %v3771_v7  ;;  %v1329_v17 = vshrl.u32 %v3118_v2, 16 }
  0xc2   : > { %2387 = vmatmul.mubr.bf16.gmra.mrb[16].mxu0 %v3749_v15  ;;  %v593_v15 = vld [vmem:[%s4218_s6 + $0x4c] sm:$0xf]  ;;  %v518_v61 = vrot.slane %v517_v54, 4  ;;  %v3054_v54 = vld [vmem:[%s4218_s6 + $0x1c] sm:$0xf] }
  0xc3   : > { %2484 = vmatmul.mubr.bf16.gmra.mrb[16].mxu1 %v2990_v25  ;;  %2394 = vmatprep.mubr.bf16.mxu0 %v2975_v62  ;;  %v669_v20 = vrot.slane %v593_v15, 5  ;;  %v3761_v25 = vld [vmem:[%s4218_s6 + $0x48] sm:$0xff]   ;;  %v528_v62 = vrot.slane %v527_v55, 4  ;;  %v1103_v15 = vrot.slane %v3052_v12, 5  ;;  %v1107_v60 = vrot.slane %v3054_v54, 5 }
  0xc4   : > { %2491 = vmatprep.mubr.bf16.mxu1 %v3754_v34  ;;  %v2976_v34 = vcombine.low %v499_v30, %v509_v31  ;;  %v523_v4 = vsel %vm4242_vm5, %v518_v61, %v522_v47  ;;  %3409 = vmatpush3.bf16.msra.mxu0 %v3770_v3  ;;  %v3019_v30 = vld [vmem:[%s4218_s6 + $0x10] sm:$0xf]  ;;  %v3053_v47 = vld [vmem:[%s4218_s6 + $0x18] sm:$0xe]  ;;  %v1325_v12 = vshll.u32 %v3118_v2, 16 }
  0xc5   : > { %v670_v26 = vsel %vm4236_vm4, %v2984_v19, %v669_v20  ;;  %v671_v27 = vrot.slane %v669_v20, 4  ;;  %v533_v5 = vsel %vm4242_vm5, %v528_v62, %v532_v51  ;;  %v1292_v19 = vshrl.u32 %v3114_v16, 16 }
  0xc6   : > { %v1295_v20 = vshll.u32 %v3114_v16, 16  ;;  %v828_v43 = vshll.u32 %v3019_v30, 16  ;;  %v1327_v23 = vrot.slane %v1325_v12, 5 }
  0xc7   : > { %v673_v32 = vsel %vm4236_vm4, %v671_v27, %v672_v21  ;;  %v1101_v21 = vsel %vm4236_vm4, %v3074_v13, %v1100_v14  ;;  %v1294_v27 = vrot.slane %v1292_v19, 4  ;;  %v3022_v13 = vld [vmem:[%s4218_s6 + $0x1c] sm:$0xf]  ;;  %v3023_v19 = vld [vmem:[%s4218_s6 + $0x20] sm:$0x1] }
  0xc8   : > { %v2992_v35 = vcombine.low %v670_v26, %v673_v32  ;;  %v4377_v26 = vld [vmem:[#allocation6 + $0x200] sm:$0xff]   ;;  %v1297_v28 = vrot.slane %v1295_v20, 5  ;;  %v1104_v32 = vsel %vm4236_vm4, %v1102_v22, %v1103_v15  ;;  %v830_v52 = vrot.slane %v828_v43, 5  ;;  %v3775_v14 = vld [vmem:[#allocation6 + $0x208] sm:$0xff]   ;;  %v3058_v43 = vld [vmem:[%s4218_s6 + $0x2c] sm:$0x1] }
  0xc9   : > { %3538 = vmatprep.subr.bf16.mxu0 %v4377_v26  ;;  %3570 = vmatprep.subr.bf16.mxu1 %v4377_v26  ;;  %v3082_v37 = vcombine.low %v1101_v21, %v1104_v32  ;;  %v856_v32 = vshrl.u32 %v3022_v13, 16  ;;  %v1117_v54 = vrot.slane %v3058_v43, 5 }
  0xca   : > { %2395 = vmatmul.mubr.bf16.gmra.mrb[20].mxu0 %v3755_v53  ;;  %v596_v53 = vld [vmem:[%s4218_s6 + $0x58] sm:$0xf]  ;;  %v1298_v38 = vor.u32 %v1297_v28, %v1294_v27 }
  0xcb   : > { %2492 = vmatmul.mubr.bf16.gmra.mrb[20].mxu1 %v2991_v63  ;;  %2402 = vmatprep.mubr.bf16.mxu0 %v2976_v34  ;;  %v676_v58 = vrot.slane %v596_v53, 5  ;;  %v3767_v63 = vld [vmem:[%s4218_s6 + $0x54] sm:$0xff]   ;;  %v1307_v34 = vrot.slane %v1305_v24, 4 }
  0xcc   : > { %2499 = vmatprep.mubr.bf16.mxu1 %v3760_v8  ;;  %v2977_v8 = vcombine.low %v523_v4, %v533_v5  ;;  %v1299_v45 = vrot.slane %v1298_v38, 4  ;;  %v1109_v5 = vrot.slane %v1107_v60, 4  ;;  %v3057_v38 = vld [vmem:[%s4218_s6 + $0x28] sm:$0xf] }
  0xcd   : > { %v677_v0 = vsel %vm4236_vm4, %v2985_v57, %v676_v58  ;;  %v678_v1 = vrot.slane %v676_v58, 4  ;;  %v1308_v41 = vor.u32 %v1307_v34, %v1303_v33  ;;  %v3772_v57 = vld [vmem:[%s4218_s6 + $0x18] sm:$0xff]   ;;  %v3055_v58 = vld [vmem:[%s4218_s6 + $0x20] sm:$0x1] }
  0xce   : > { %v1304_v55 = vsel %vm4242_vm5, %v1299_v45, %v1303_v33  ;;  %v4408_v33 = vld [vmem:[#allocation6 + $0x210] sm:$0xff]  }
  0xcf   : > { %v680_v6 = vsel %vm4236_vm4, %v678_v1, %v679_v59  ;;  %v1309_v50 = vrot.slane %v1308_v41, 4  ;;  %v3075_v59 = vrot.slane %v3053_v47, 9  ;;  %v3117_v1 = vld [vmem:[%s4218_s6 + $0x24] sm:$0xf] }
  0xd0   : > { %v2993_v9 = vcombine.low %v677_v0, %v680_v6  ;;  %v1110_v0 = vrot.slane %v3055_v58, 5  ;;  %v3119_v6 = vld [vmem:[%s4218_s6 + $0x2c] sm:$0x1]  ;;  %v1316_v7 = vshrl.u32 %v3117_v1, 16  ;;  %v1319_v11 = vshll.u32 %v3117_v1, 16 }
  0xd1   : > { %v1314_v61 = vsel %vm4242_vm5, %v1309_v50, %v1313_v39  ;;  %v1108_v4 = vsel %vm4236_vm4, %v3075_v59, %v1107_v60  ;;  %v1335_v18 = vshll.u32 %v3119_v6, 16  ;;  %v1114_v50 = vrot.slane %v3057_v38, 5 }
  0xd2   : > { %2403 = vmatmul.mubr.bf16.gmra.mrb[24].mxu0 %v3761_v25  ;;  %v3018_v25 = vld [vmem:[%s4218_s6 + $0xc] sm:$0xf]  ;;  %v3138_v3 = vcombine.low %v1304_v55, %v1314_v61  ;;  %v1111_v15 = vsel %vm4236_vm4, %v1109_v5, %v1110_v0  ;;  %v1318_v16 = vrot.slane %v1316_v7, 4  ;;  %v1321_v22 = vrot.slane %v1319_v11, 5  ;;  %v3121_v55 = vld [vmem:[%s4218_s6 + $0x34] sm:$0xf] }
  0xd3   : > { %2500 = vmatmul.mubr.bf16.gmra.mrb[24].mxu1 %v2992_v35  ;;  %2410 = vmatprep.mubr.bf16.mxu0 %v2977_v8  ;;  %v819_v31 = vshrl.u32 %v3018_v25, 16  ;;  %v3020_v35 = vld [vmem:[%s4218_s6 + $0x14] sm:$0x1]  ;;  %v822_v36 = vshll.u32 %v3018_v25, 16  ;;  %v3021_v8 = vld [vmem:[%s4218_s6 + $0x18] sm:$0xf]  ;;  %v3083_v21 = vcombine.low %v1108_v4, %v1111_v15 }
  0xd4   : > { %2507 = vmatprep.mubr.bf16.mxu1 %v3766_v44  ;;  %v832_v44 = vshrl.u32 %v3019_v30, 16  ;;  %v838_v46 = vshll.u32 %v3020_v35, 16  ;;  %v1331_v25 = vrot.slane %v1329_v17, 4  ;;  %v1337_v27 = vrot.slane %v1335_v18, 5  ;;  %v3026_v4 = vld [vmem:[%s4218_s6 + $0x2c] sm:$0x1] }
  0xd5   : > { %v821_v40 = vrot.slane %v819_v31, 4  ;;  %v824_v42 = vrot.slane %v822_v36, 5  ;;  %v843_v28 = vshrl.u32 %v3021_v8, 16  ;;  %v1322_v29 = vor.u32 %v1321_v22, %v1318_v16  ;;  %v3781_v17 = vld [vmem:[#allocation6 + $0x220] sm:$0xff]  }
  0xd6   : > { %v834_v53 = vrot.slane %v832_v44, 4  ;;  %v840_v56 = vrot.slane %v838_v46, 5  ;;  %v846_v30 = vshll.u32 %v3021_v8, 16  ;;  %v852_v31 = vshll.u32 %v3022_v13, 16  ;;  %v3774_v46 = vld [vmem:[%s4218_s6 + $0x24] sm:$0xff]  }
  0xd7   : > { %v825_v51 = vor.u32 %v824_v42, %v821_v40  ;;  %v1332_v34 = vor.u32 %v1331_v25, %v1327_v23  ;;  %v845_v35 = vrot.slane %v843_v28, 4  ;;  %v862_v36 = vshll.u32 %v3023_v19, 16  ;;  %v3059_v22 = vld [vmem:[%s4218_s6 + $0x30] sm:$0xe]  ;;  %v3060_v28 = vld [vmem:[%s4218_s6 + $0x34] sm:$0xf] }
  0xd8   : > { %v1323_v39 = vrot.slane %v1322_v29, 4  ;;  %v848_v40 = vrot.slane %v846_v30, 5  ;;  %v854_v41 = vrot.slane %v852_v31, 5  ;;  %v858_v42 = vrot.slane %v856_v32, 4  ;;  %v4443_v29 = vld [vmem:[#allocation6 + $0x228] sm:$0xff]  }
  0xd9   : > { %v826_v62 = vrot.slane %v825_v51, 4  ;;  %v1333_v44 = vrot.slane %v1332_v34, 4  ;;  %v864_v45 = vrot.slane %v862_v36, 5  ;;  %v3120_v51 = vld [vmem:[%s4218_s6 + $0x30] sm:$0xf]  ;;  %v1116_v60 = vrot.slane %v1114_v50, 4 }
  0xda   : > { %2411 = vmatmul.mubr.bf16.gmra.mrb[28].mxu0 %v3767_v63  ;;  %v835_v63 = vor.u32 %v834_v53, %v830_v52  ;;  %v859_v53 = vor.u32 %v858_v42, %v854_v41  ;;  %v1340_v61 = vshrl.u32 %v3120_v51, 16  ;;  %v1349_v7 = vshll.u32 %v3121_v55, 16  ;;  %v3776_v42 = vld [vmem:[%s4218_s6 + $0x30] sm:$0xff]  }
  0xdb   : > { %2508 = vmatmul.mubr.bf16.gmra.mrb[28].mxu1 %v2993_v9  ;;  %2548 = vmatprep.mubr.bf16.mxu0 %v3082_v37  ;;  %v831_v9 = vsel %vm4242_vm5, %v826_v62, %v830_v52  ;;  %v3056_v37 = vld [vmem:[%s4218_s6 + $0x24] sm:$0xe]  ;;  %v849_v52 = vor.u32 %v848_v40, %v845_v35  ;;  %v1338_v58 = vsel %vm4242_vm5, %v1333_v44, %v1337_v27  ;;  %v1353_v8 = vshrl.u32 %v3121_v55, 16 }
  0xdc   : > { %v836_v10 = vrot.slane %v835_v63, 4  ;;  %2645 = vmatprep.mubr.bf16.mxu1 %v3138_v3  ;;  %v3076_v47 = vrot.slane %v3056_v37, 9  ;;  %v3024_v62 = vld [vmem:[%s4218_s6 + $0x24] sm:$0xf]  ;;  %v3025_v63 = vld [vmem:[%s4218_s6 + $0x28] sm:$0xf]  ;;  %v1118_v5 = vsel %vm4236_vm4, %v1116_v60, %v1117_v54 }
  0xdd   : > { %v850_v1 = vrot.slane %v849_v52, 4  ;;  %v860_v2 = vrot.slane %v859_v53, 4  ;;  %v1343_v3 = vshll.u32 %v3120_v51, 16  ;;  %v1342_v6 = vrot.slane %v1340_v61, 4  ;;  %v3027_v52 = vld [vmem:[%s4218_s6 + $0x30] sm:$0xf] }
  0xde   : > { %v841_v20 = vsel %vm4242_vm5, %v836_v10, %v840_v56  ;;  %v3122_v56 = vld [vmem:[%s4218_s6 + $0x38] sm:$0x1]  ;;  %v1115_v59 = vsel %vm4236_vm4, %v3076_v47, %v1114_v50  ;;  %v1355_v15 = vrot.slane %v1353_v8, 4  ;;  %v867_v19 = vshrl.u32 %v3024_v62, 16  ;;  %v3125_v50 = vld [vmem:[%s4218_s6 + $0x44] sm:$0x1] }
  0xdf   : > { %v3042_v24 = vcombine.low %v831_v9, %v841_v20  ;;  %v855_v9 = vsel %vm4242_vm5, %v850_v1, %v854_v41  ;;  %v865_v10 = vsel %vm4242_vm5, %v860_v2, %v864_v45  ;;  %v3084_v11 = vcombine.low %v1115_v59, %v1118_v5  ;;  %v3124_v45 = vld [vmem:[%s4218_s6 + $0x40] sm:$0xf]  ;;  %v3028_v59 = vld [vmem:[%s4218_s6 + $0x34] sm:$0xf]  ;;  %v3062_v8 = vld [vmem:[%s4218_s6 + $0x3c] sm:$0xe] }
  0xe0   : > { %v1345_v12 = vrot.slane %v1343_v3, 5  ;;  %v3043_v13 = vcombine.low %v855_v9, %v865_v10  ;;  %v1359_v16 = vshll.u32 %v3122_v56, 16  ;;  %v870_v20 = vshll.u32 %v3024_v62, 16  ;;  %v4457_v53 = vld [vmem:[#allocation6 + $0x230] sm:$0xff]  }
  0xe1   : > { %v880_v25 = vshrl.u32 %v3025_v63, 16  ;;  %v886_v27 = vshll.u32 %v3026_v4, 16  ;;  %v869_v31 = vrot.slane %v867_v19, 4  ;;  %v3077_v38 = vrot.slane %v3059_v22, 9  ;;  %v3064_v19 = vld [vmem:[%s4218_s6 + $0x44] sm:$0x1] }
  0xe2   : > { %2549 = vmatmul.mubr.bf16.vlgmr.msra.gmra.mrb[32].mxu0 %v3042_v24  ;;  %v1346_v18 = vor.u32 %v1345_v12, %v1342_v6  ;;  %v1361_v24 = vrot.slane %v1359_v16, 5  ;;  %v872_v32 = vrot.slane %v870_v20, 5  ;;  %v1121_v43 = vrot.slane %v3060_v28, 5 }
  0xe3   : > { %2646 = vmatmul.mubr.bf16.vlgmr.msra.gmra.mrb[32].mxu1 %v3772_v57  ;;  %3539 = vmatpush3.bf16.msra.mxu0 %v4377_v26  ;;  %v4421_v57 = vld [vmem:[#allocation6 + $0x218] sm:$0xff]   ;;  %v882_v36 = vrot.slane %v880_v25, 4  ;;  %v888_v37 = vrot.slane %v886_v27, 5  ;;  %v1373_v62 = vshll.u32 %v3124_v45, 16  ;;  %v1377_v1 = vshrl.u32 %v3124_v45, 16 }
  0xe4   : > { %3578 = vmatpush3.bf16.msra.mxu1 %v4377_v26  ;;  %2556 = vmatprep.mubr.bf16.mxu0 %v3083_v21  ;;  %v1328_v26 = vsel %vm4242_vm5, %v1323_v39, %v1327_v23  ;;  %v876_v21 = vshll.u32 %v3025_v63, 16  ;;  %v1347_v30 = vrot.slane %v1346_v18, 4  ;;  %v3123_v39 = vld [vmem:[%s4218_s6 + $0x3c] sm:$0xf]  ;;  %v873_v41 = vor.u32 %v872_v32, %v869_v31  ;;  %v3127_v31 = vld [vmem:[%s4218_s6 + $0x4c] sm:$0xf] }
  0xe5   : > { %3571 = vmatprep.subr.bf16.mxu1 %v3775_v14  ;;  %3540 = vmatprep.subr.bf16.mxu0 %v3775_v14  ;;  %v3139_v0 = vcombine.low %v1328_v26, %v1338_v58  ;;  %v1364_v51 = vshrl.u32 %v3123_v39, 16  ;;  %v1367_v26 = vshll.u32 %v3123_v39, 16  ;;  %v1122_v56 = vsel %vm4236_vm4, %v3077_v38, %v1121_v43  ;;  %v3128_v39 = vld [vmem:[%s4218_s6 + $0x50] sm:$0x1] }
  0xe6   : > { %v878_v34 = vrot.slane %v876_v21, 5  ;;  %v874_v55 = vrot.slane %v873_v41, 4  ;;  %v1123_v58 = vrot.slane %v1121_v43, 4  ;;  %v1383_v2 = vshll.u32 %v3125_v50, 16 }
  0xe7   : > { %3541 = vmatpush3.bf16.msra.mxu0 %v3775_v14  ;;  %2653 = vmatprep.mubr.bf16.mxu1 %v3139_v0  ;;  %v1366_v60 = vrot.slane %v1364_v51, 4  ;;  %v1369_v61 = vrot.slane %v1367_v26, 5  ;;  %v1375_v6 = vrot.slane %v1373_v62, 5  ;;  %v1379_v10 = vrot.slane %v1377_v1, 4  ;;  %v3065_v1 = vld [vmem:[%s4218_s6 + $0x48] sm:$0xe] }
  0xe8   : > { %3579 = vmatpush3.bf16.msra.mxu1 %v3775_v14  ;;  %3542 = vmatprep.subr.bf16.mxu0 %v4408_v33  ;;  %v1351_v14 = vrot.slane %v1349_v7, 5  ;;  %v883_v47 = vor.u32 %v882_v36, %v878_v34  ;;  %v879_v63 = vsel %vm4242_vm5, %v874_v55, %v878_v34  ;;  %v3029_v7 = vld [vmem:[%s4218_s6 + $0x38] sm:$0x1]  ;;  %v891_v12 = vshrl.u32 %v3027_v52, 16 }
  0xe9   : > { %3572 = vmatprep.subr.bf16.mxu1 %v4408_v33  ;;  %v1370_v5 = vor.u32 %v1369_v61, %v1366_v60  ;;  %v894_v16 = vshll.u32 %v3027_v52, 16  ;;  %v904_v18 = vshrl.u32 %v3028_v59, 16  ;;  %v1380_v20 = vor.u32 %v1379_v10, %v1375_v6  ;;  %v3032_v60 = vld [vmem:[%s4218_s6 + $0x44] sm:$0x1] }
  0xea   : > { %2557 = vmatmul.mubr.bf16.gmra.mrb[36].mxu0 %v3043_v13  ;;  %v1356_v23 = vor.u32 %v1355_v15, %v1351_v14  ;;  %v1352_v40 = vsel %vm4242_vm5, %v1347_v30, %v1351_v14  ;;  %v3063_v13 = vld [vmem:[%s4218_s6 + $0x40] sm:$0xf]  ;;  %v4474_v14 = vld [vmem:[#allocation6 + $0x238] sm:$0xff]   ;;  %v893_v21 = vrot.slane %v891_v12, 4  ;;  %v910_v22 = vshll.u32 %v3029_v7, 16 }
  0xeb   : > { %2654 = vmatmul.mubr.bf16.gmra.mrb[36].mxu1 %v3774_v46  ;;  %3543 = vmatpush3.bf16.msra.mxu0 %v4408_v33  ;;  %v1371_v15 = vrot.slane %v1370_v5, 4  ;;  %v896_v27 = vrot.slane %v894_v16, 5  ;;  %v906_v30 = vrot.slane %v904_v18, 4  ;;  %v1381_v32 = vrot.slane %v1380_v20, 4  ;;  %v3067_v7 = vld [vmem:[%s4218_s6 + $0x50] sm:$0x1] }
  0xec   : > { %3580 = vmatpush3.bf16.msra.mxu1 %v4408_v33  ;;  %3544 = vmatprep.subr.bf16.mxu0 %v4421_v57  ;;  %v3061_v33 = vld [vmem:[%s4218_s6 + $0x38] sm:$0x1]  ;;  %v1357_v35 = vrot.slane %v1356_v23, 4  ;;  %v3078_v23 = vrot.slane %v3062_v8, 9  ;;  %v912_v34 = vrot.slane %v910_v22, 5  ;;  %v1131_v36 = vrot.slane %v3064_v19, 5 }
  0xed   : > { %3573 = vmatprep.subr.bf16.mxu1 %v4421_v57  ;;  %2564 = vmatprep.mubr.bf16.mxu0 %v3084_v11  ;;  %v1124_v44 = vrot.slane %v3061_v33, 5  ;;  %v1385_v11 = vrot.slane %v1383_v2, 5  ;;  %v1376_v25 = vsel %vm4242_vm5, %v1371_v15, %v1375_v6  ;;  %v3778_v33 = vld [vmem:[%s4218_s6 + $0x3c] sm:$0xff]   ;;  %v1397_v45 = vshll.u32 %v3127_v31, 16  ;;  %v3066_v2 = vld [vmem:[%s4218_s6 + $0x4c] sm:$0xf] }
  0xee   : > { %v1362_v46 = vsel %vm4242_vm5, %v1357_v35, %v1361_v24  ;;  %v3126_v24 = vld [vmem:[%s4218_s6 + $0x48] sm:$0xf]  ;;  %v1128_v35 = vrot.slane %v3063_v13, 5  ;;  %v3129_v12 = vld [vmem:[%s4218_s6 + $0x54] sm:$0xf] }
  0xef   : > { %3545 = vmatpush3.bf16.msra.mxu0 %v4421_v57  ;;  %v3140_v54 = vcombine.low %v1352_v40, %v1362_v46  ;;  %v1125_v0 = vsel %vm4236_vm4, %v1123_v58, %v1124_v44  ;;  %v1388_v40 = vshrl.u32 %v3126_v24, 16  ;;  %v1391_v41 = vshll.u32 %v3126_v24, 16  ;;  %v3031_v46 = vld [vmem:[%s4218_s6 + $0x40] sm:$0xf]  ;;  %v3130_v22 = vld [vmem:[%s4218_s6 + $0x58] sm:$0xf] }
  0xf0   : > { %3581 = vmatpush3.bf16.msra.mxu1 %v4421_v57  ;;  %3546 = vmatprep.subr.bf16.mxu0 %v3781_v17  ;;  %v884_v57 = vrot.slane %v883_v47, 4  ;;  %v3085_v4 = vcombine.low %v1122_v56, %v1125_v0  ;;  %v1129_v43 = vsel %vm4236_vm4, %v3078_v23, %v1128_v35  ;;  %v1130_v44 = vrot.slane %v1128_v35, 4 }
  0xf1   : > { %3574 = vmatprep.subr.bf16.mxu1 %v3781_v17  ;;  %2661 = vmatprep.mubr.bf16.mxu1 %v3140_v54  ;;  %v1390_v26 = vrot.slane %v1388_v40, 4  ;;  %v1393_v54 = vrot.slane %v1391_v41, 5  ;;  %v1399_v55 = vrot.slane %v1397_v45, 5  ;;  %v1401_v56 = vshrl.u32 %v3127_v31, 16 }
  0xf2   : > { %v889_v3 = vsel %vm4242_vm5, %v884_v57, %v888_v37  ;;  %v897_v37 = vor.u32 %v896_v27, %v893_v21  ;;  %v1132_v52 = vsel %vm4236_vm4, %v1130_v44, %v1131_v36  ;;  %v1407_v57 = vshll.u32 %v3128_v39, 16  ;;  %v3131_v27 = vld [vmem:[%s4218_s6 + $0x5c] sm:$0x1] }
  0xf3   : > { %3547 = vmatpush3.bf16.msra.mxu0 %v3781_v17  ;;  %2662 = vmatmul.mubr.bf16.gmra.mrb[40].mxu1 %v3776_v42  ;;  %v3044_v9 = vcombine.low %v879_v63, %v889_v3  ;;  %v3030_v42 = vld [vmem:[%s4218_s6 + $0x3c] sm:$0xf]  ;;  %v1394_v62 = vor.u32 %v1393_v54, %v1390_v26  ;;  %v1403_v63 = vrot.slane %v1401_v56, 4  ;;  %v924_v5 = vshll.u32 %v3031_v46, 16  ;;  %v3068_v54 = vld [vmem:[%s4218_s6 + $0x54] sm:$0xe] }
  0xf4   : > { %3582 = vmatpush3.bf16.msra.mxu1 %v3781_v17  ;;  %3548 = vmatprep.subr.bf16.mxu0 %v4443_v29  ;;  %v900_v17 = vshll.u32 %v3028_v59, 16  ;;  %v898_v50 = vrot.slane %v897_v37, 4  ;;  %v3086_v59 = vcombine.low %v1129_v43, %v1132_v52  ;;  %v915_v0 = vshrl.u32 %v3030_v42, 16 }
  0xf5   : > { %3575 = vmatprep.subr.bf16.mxu1 %v4443_v29  ;;  %2565 = vmatmul.mubr.bf16.gmra.mrb[40].mxu0 %v3044_v9  ;;  %v1409_v3 = vrot.slane %v1407_v57, 5  ;;  %v928_v6 = vshrl.u32 %v3031_v46, 16  ;;  %v1395_v8 = vrot.slane %v1394_v62, 4  ;;  %v1404_v9 = vor.u32 %v1403_v63, %v1399_v55  ;;  %v3070_v57 = vld [vmem:[%s4218_s6 + $0x5c] sm:$0x1] }
  0xf6   : > { %2572 = vmatprep.mubr.bf16.mxu0 %v3085_v4  ;;  %v902_v28 = vrot.slane %v900_v17, 5  ;;  %v918_v4 = vshll.u32 %v3030_v42, 16  ;;  %v917_v10 = vrot.slane %v915_v0, 4  ;;  %v926_v15 = vrot.slane %v924_v5, 5  ;;  %v3132_v0 = vld [vmem:[%s4218_s6 + $0x60] sm:$0xf] }
  0xf7   : > { %3549 = vmatpush3.bf16.msra.mxu0 %v4443_v29  ;;  %v930_v16 = vrot.slane %v928_v6, 4  ;;  %v3079_v17 = vrot.slane %v3065_v1, 9  ;;  %v1400_v18 = vsel %vm4242_vm5, %v1395_v8, %v1399_v55  ;;  %v1405_v19 = vrot.slane %v1404_v9, 4  ;;  %v3069_v55 = vld [vmem:[%s4218_s6 + $0x58] sm:$0xf] }
  0xf8   : > { %3583 = vmatpush3.bf16.msra.mxu1 %v4443_v29  ;;  %3550 = vmatprep.subr.bf16.mxu0 %v4457_v53  ;;  %v907_v38 = vor.u32 %v906_v30, %v902_v28  ;;  %v1386_v29 = vsel %vm4242_vm5, %v1381_v32, %v1385_v11  ;;  %v903_v58 = vsel %vm4242_vm5, %v898_v50, %v902_v28  ;;  %v934_v11 = vshll.u32 %v3032_v60, 16  ;;  %v3133_v5 = vld [vmem:[%s4218_s6 + $0x64] sm:$0xf] }
  0xf9   : > { %3576 = vmatprep.subr.bf16.mxu1 %v4457_v53  ;;  %v3141_v47 = vcombine.low %v1376_v25, %v1386_v29  ;;  %v920_v13 = vrot.slane %v918_v4, 5  ;;  %v1135_v21 = vrot.slane %v3066_v2, 5  ;;  %v931_v24 = vor.u32 %v930_v16, %v926_v15  ;;  %v3034_v29 = vld [vmem:[%s4218_s6 + $0x4c] sm:$0xf] }
  0xfa   : > { %v908_v51 = vrot.slane %v907_v38, 4  ;;  %v936_v20 = vrot.slane %v934_v11, 5  ;;  %v1138_v25 = vrot.slane %v3067_v7, 5  ;;  %v1412_v28 = vshrl.u32 %v3129_v12, 16 }
  0xfb   : > { %3551 = vmatpush3.bf16.msra.mxu0 %v4457_v53  ;;  %2669 = vmatprep.mubr.bf16.mxu1 %v3141_v47  ;;  %v921_v23 = vor.u32 %v920_v13, %v917_v10  ;;  %v1410_v30 = vsel %vm4242_vm5, %v1405_v19, %v1409_v3  ;;  %v1136_v31 = vsel %vm4236_vm4, %v3079_v17, %v1135_v21  ;;  %v1137_v32 = vrot.slane %v1135_v21, 4  ;;  %v3035_v47 = vld [vmem:[%s4218_s6 + $0x50] sm:$0x1]  ;;  %v3134_v10 = vld [vmem:[%s4218_s6 + $0x68] sm:$0x1] }
  0xfc   : > { %3584 = vmatpush3.bf16.msra.mxu1 %v4457_v53  ;;  %3552 = vmatprep.subr.bf16.mxu0 %v4474_v14  ;;  %v913_v53 = vsel %vm4242_vm5, %v908_v51, %v912_v34  ;;  %v1415_v34 = vshll.u32 %v3129_v12, 16  ;;  %v3142_v35 = vcombine.low %v1400_v18, %v1410_v30  ;;  %v932_v37 = vrot.slane %v931_v24, 4  ;;  %v3782_v12 = vld [vmem:[%s4218_s6 + $0x54] sm:$0xff]  }
  0xfd   : > { %3577 = vmatprep.subr.bf16.mxu1 %v4474_v14  ;;  %v3045_v61 = vcombine.low %v903_v58, %v913_v53  ;;  %2670 = vmatmul.mubr.bf16.gmra.mrb[44].mxu1 %v3778_v33  ;;  %v3033_v33 = vld [vmem:[%s4218_s6 + $0x48] sm:$0xf]  ;;  %v922_v36 = vrot.slane %v921_v23, 4  ;;  %v1414_v38 = vrot.slane %v1412_v28, 4  ;;  %v1139_v39 = vsel %vm4236_vm4, %v1137_v32, %v1138_v25  ;;  %v3036_v24 = vld [vmem:[%s4218_s6 + $0x54] sm:$0xf] }
  0xfe   : > { %v1417_v40 = vrot.slane %v1415_v34, 5  ;;  %v1421_v41 = vshll.u32 %v3130_v22, 16  ;;  %v1425_v42 = vshrl.u32 %v3130_v22, 16  ;;  %2677 = vmatprep.mubr.bf16.mxu1 %v3142_v35  ;;  %v937_v44 = vsel %vm4242_vm5, %v932_v37, %v936_v20  ;;  %v3037_v35 = vld [vmem:[%s4218_s6 + $0x58] sm:$0xf] }
  0xff   : > { %3553 = vmatpush3.bf16.msra.mxu0 %v4474_v14  ;;  %v927_v43 = vsel %vm4242_vm5, %v922_v36, %v926_v15  ;;  %v3087_v45 = vcombine.low %v1136_v31, %v1139_v39  ;;  %v1431_v46 = vshll.u32 %v3131_v27, 16  ;;  %v939_v58 = vshrl.u32 %v3033_v33, 16  ;;  %v3038_v36 = vld [vmem:[%s4218_s6 + $0x5c] sm:$0x1] }
 0x100   : > { %3585 = vmatpush3.bf16.msra.mxu1 %v4474_v14  ;;  %2573 = vmatmul.mubr.bf16.gmra.mrb[44].mxu0 %v3045_v61  ;;  %v3780_v14 = vld [vmem:[%s4218_s6 + $0x48] sm:$0xff]   ;;  %v3046_v50 = vcombine.low %v927_v43, %v937_v44  ;;  %v1418_v51 = vor.u32 %v1417_v40, %v1414_v38  ;;  %v1423_v26 = vrot.slane %v1421_v41, 5  ;;  %v1427_v52 = vrot.slane %v1425_v42, 4  ;;  %v3071_v41 = vld [vmem:[%s4218_s6 + $0x60] sm:$0xe] }
 0x101   : > { %2580 = vmatprep.mubr.bf16.mxu0 %v3086_v59  ;;  %v1433_v56 = vrot.slane %v1431_v46, 5  ;;  %v942_v53 = vshll.u32 %v3033_v33, 16  ;;  %v948_v59 = vshll.u32 %v3034_v29, 16  ;;  %v952_v62 = vshrl.u32 %v3034_v29, 16  ;;  %v3072_v42 = vld [vmem:[%s4218_s6 + $0x64] sm:$0xf] }
 0x102   : > { %v1419_v60 = vrot.slane %v1418_v51, 4  ;;  %v1428_v61 = vor.u32 %v1427_v52, %v1423_v26  ;;  %v958_v63 = vshll.u32 %v3035_v47, 16  ;;  %v941_v1 = vrot.slane %v939_v58, 4  ;;  %v3073_v46 = vld [vmem:[%s4218_s6 + $0x68] sm:$0x1] }
 0x103   : > { %v944_v2 = vrot.slane %v942_v53, 5  ;;  %v950_v3 = vrot.slane %v948_v59, 5  ;;  %v3080_v4 = vrot.slane %v3068_v54, 9  ;;  %v954_v8 = vrot.slane %v952_v62, 4  ;;  %v3135_v52 = vld [vmem:[%s4218_s6 + $0x6c] sm:$0xf] }
 0x104   : > { %v1424_v6 = vsel %vm4242_vm5, %v1419_v60, %v1423_v26  ;;  %v1429_v7 = vrot.slane %v1428_v61, 4  ;;  %v960_v9 = vrot.slane %v958_v63, 5  ;;  %v1142_v13 = vrot.slane %v3069_v55, 5  ;;  %v3136_v53 = vld [vmem:[%s4218_s6 + $0x70] sm:$0xf] }
 0x105   : > { %2678 = vmatmul.mubr.bf16.gmra.mrb[48].mxu1 %v3780_v14  ;;  %v945_v11 = vor.u32 %v944_v2, %v941_v1  ;;  %v1145_v15 = vrot.slane %v3070_v57, 5  ;;  %v1436_v16 = vshrl.u32 %v3132_v0, 16  ;;  %v955_v18 = vor.u32 %v954_v8, %v950_v3  ;;  %v3137_v2 = vld [vmem:[%s4218_s6 + $0x74] sm:$0x1] }
 0x106   : > { %v1434_v17 = vsel %vm4242_vm5, %v1429_v7, %v1433_v56  ;;  %v1439_v19 = vshll.u32 %v3132_v0, 16  ;;  %v1445_v20 = vshll.u32 %v3133_v5, 16  ;;  %v1143_v22 = vsel %vm4236_vm4, %v3080_v4, %v1142_v13 }
 0x107   : > { %v3143_v14 = vcombine.low %v1424_v6, %v1434_v17  ;;  %v946_v21 = vrot.slane %v945_v11, 4  ;;  %v1144_v23 = vrot.slane %v1142_v13, 4  ;;  %v956_v25 = vrot.slane %v955_v18, 4  ;;  %v3040_v18 = vld [vmem:[%s4218_s6 + $0x64] sm:$0xf] }
 0x108   : > { %2581 = vmatmul.mubr.bf16.gmra.mrb[48].mxu0 %v3046_v50  ;;  %v1438_v27 = vrot.slane %v1436_v16, 4  ;;  %v1441_v28 = vrot.slane %v1439_v19, 5  ;;  %v1447_v30 = vrot.slane %v1445_v20, 5  ;;  %v1449_v34 = vshrl.u32 %v3133_v5, 16 }
 0x109   : > { %2588 = vmatprep.mubr.bf16.mxu0 %v3087_v45  ;;  %2685 = vmatprep.mubr.bf16.mxu1 %v3143_v14  ;;  %v951_v31 = vsel %vm4242_vm5, %v946_v21, %v950_v3  ;;  %v1146_v32 = vsel %vm4236_vm4, %v1144_v23, %v1145_v15  ;;  %v1455_v33 = vshll.u32 %v3134_v10, 16  ;;  %v961_v37 = vsel %vm4242_vm5, %v956_v25, %v960_v9  ;;  %v3784_v9 = vld [vmem:[%s4218_s6 + $0x60] sm:$0xff]  }
 0x10a   : > { %v3088_v38 = vcombine.low %v1143_v22, %v1146_v32  ;;  %v1442_v39 = vor.u32 %v1441_v28, %v1438_v27  ;;  %v963_v40 = vshrl.u32 %v3036_v24, 16  ;;  %v3047_v29 = vcombine.low %v951_v31, %v961_v37  ;;  %v3041_v22 = vld [vmem:[%s4218_s6 + $0x68] sm:$0x1]  ;;  %v3146_v28 = vld [vmem:[%s4218_s6 + $0x18] sm:$0xe] }
 0x10b   : > { %v1451_v43 = vrot.slane %v1449_v34, 4  ;;  %v1457_v44 = vrot.slane %v1455_v33, 5  ;;  %v966_v45 = vshll.u32 %v3036_v24, 16  ;;  %v972_v51 = vshll.u32 %v3037_v35, 16  ;;  %v3147_v33 = vld [vmem:[%s4218_s6 + $0x1c] sm:$0xf] }
 0x10c   : > { %v1443_v47 = vrot.slane %v1442_v39, 4  ;;  %v965_v50 = vrot.slane %v963_v40, 4  ;;  %v976_v26 = vshrl.u32 %v3037_v35, 16  ;;  %v982_v56 = vshll.u32 %v3038_v36, 16  ;;  %v3148_v35 = vld [vmem:[%s4218_s6 + $0x20] sm:$0x1] }
 0x10d   : > { %2686 = vmatmul.mubr.bf16.gmra.mrb[52].mxu1 %v3782_v12  ;;  %v1452_v54 = vor.u32 %v1451_v43, %v1447_v30  ;;  %v968_v55 = vrot.slane %v966_v45, 5  ;;  %v3081_v58 = vrot.slane %v3071_v41, 9  ;;  %v974_v57 = vrot.slane %v972_v51, 5  ;;  %v3039_v12 = vld [vmem:[%s4218_s6 + $0x60] sm:$0xf] }
 0x10e   : > { %v1448_v59 = vsel %vm4242_vm5, %v1443_v47, %v1447_v30  ;;  %v978_v60 = vrot.slane %v976_v26, 4  ;;  %v1149_v61 = vrot.slane %v3072_v42, 5  ;;  %v984_v0 = vrot.slane %v982_v56, 5  ;;  %v3158_v40 = vld [vmem:[%s4218_s6 + $0x48] sm:$0xe] }
 0x10f   : > { %v1453_v62 = vrot.slane %v1452_v54, 4  ;;  %v969_v63 = vor.u32 %v968_v55, %v965_v50  ;;  %v1152_v1 = vrot.slane %v3073_v46, 5  ;;  %v1460_v6 = vshrl.u32 %v3135_v52, 16  ;;  %v3160_v51 = vld [vmem:[%s4218_s6 + $0x50] sm:$0x1] }
 0x110   : > { %2589 = vmatmul.mubr.bf16.gmra.mrb[52].mxu0 %v3047_v29  ;;  %v979_v3 = vor.u32 %v978_v60, %v974_v57  ;;  %v1150_v4 = vsel %vm4236_vm4, %v3081_v58, %v1149_v61  ;;  %v1151_v5 = vrot.slane %v1149_v61, 4  ;;  %v1463_v10 = vshll.u32 %v3135_v52, 16  ;;  %v3149_v56 = vld [vmem:[%s4218_s6 + $0x24] sm:$0xe]  ;;  %v3150_v61 = vld [vmem:[%s4218_s6 + $0x28] sm:$0xf] }
 0x111   : > { %2596 = vmatprep.mubr.bf16.mxu0 %v3088_v38  ;;  %v1458_v7 = vsel %vm4242_vm5, %v1453_v62, %v1457_v44  ;;  %v970_v8 = vrot.slane %v969_v63, 4  ;;  %v1469_v11 = vshll.u32 %v3136_v53, 16  ;;  %v1462_v17 = vrot.slane %v1460_v6, 4  ;;  %v3159_v44 = vld [vmem:[%s4218_s6 + $0x4c] sm:$0xf] }
 0x112   : > { %v3144_v13 = vcombine.low %v1448_v59, %v1458_v7  ;;  %v980_v15 = vrot.slane %v979_v3, 4  ;;  %v1153_v16 = vsel %vm4236_vm4, %v1151_v5, %v1152_v1  ;;  %v1465_v14 = vrot.slane %v1463_v10, 5  ;;  %v3786_v59 = vld [vmem:[%s4218_s6 + $0x6c] sm:$0xff]   ;;  %v3161_v3 = vld [vmem:[%s4218_s6 + $0x54] sm:$0xe] }
 0x113   : > { %v975_v19 = vsel %vm4242_vm5, %v970_v8, %v974_v57  ;;  %v3089_v20 = vcombine.low %v1150_v4, %v1153_v16  ;;  %v1471_v21 = vrot.slane %v1469_v11, 5  ;;  %v1473_v24 = vshrl.u32 %v3136_v53, 16  ;;  %v3151_v62 = vld [vmem:[%s4218_s6 + $0x2c] sm:$0x1]  ;;  %v3162_v8 = vld [vmem:[%s4218_s6 + $0x58] sm:$0xf] }
 0x114   : > { %2693 = vmatprep.mubr.bf16.mxu1 %v3144_v13  ;;  %v985_v23 = vsel %vm4242_vm5, %v980_v15, %v984_v0  ;;  %v1479_v25 = vshll.u32 %v3137_v2, 16  ;;  %v987_v27 = vshrl.u32 %v3039_v12, 16  ;;  %v1466_v31 = vor.u32 %v1465_v14, %v1462_v17  ;;  %v3152_v15 = vld [vmem:[%s4218_s6 + $0x30] sm:$0xe]  ;;  %v3153_v16 = vld [vmem:[%s4218_s6 + $0x34] sm:$0xf] }
 0x115   : > { %v3048_v30 = vcombine.low %v975_v19, %v985_v23  ;;  %2694 = vmatmul.mubr.bf16.gmra.mrb[56].mxu1 %v3784_v9  ;;  %v990_v32 = vshll.u32 %v3039_v12, 16  ;;  %v996_v34 = vshll.u32 %v3040_v18, 16  ;;  %v1475_v36 = vrot.slane %v1473_v24, 4  ;;  %v3163_v9 = vld [vmem:[%s4218_s6 + $0x5c] sm:$0x1] }
 0x116   : > { %v1481_v37 = vrot.slane %v1479_v25, 5  ;;  %v989_v38 = vrot.slane %v987_v27, 4  ;;  %v1000_v39 = vshrl.u32 %v3040_v18, 16  ;;  %v1467_v41 = vrot.slane %v1466_v31, 4  ;;  %v3154_v17 = vld [vmem:[%s4218_s6 + $0x38] sm:$0x1] }
 0x117   : > { %v992_v42 = vrot.slane %v990_v32, 5  ;;  %v998_v29 = vrot.slane %v996_v34, 5  ;;  %v1006_v43 = vshll.u32 %v3041_v22, 16  ;;  %v1476_v45 = vor.u32 %v1475_v36, %v1471_v21  ;;  %v3165_v27 = vld [vmem:[%s4218_s6 + $0x64] sm:$0xf] }
 0x118   : > { %2597 = vmatmul.mubr.bf16.gmra.mrb[56].mxu0 %v3048_v30  ;;  %v1002_v46 = vrot.slane %v1000_v39, 4  ;;  %v3170_v47 = vrot.slane %v3146_v28, 9  ;;  %v1573_v50 = vrot.slane %v3147_v33, 5  ;;  %v1472_v26 = vsel %vm4242_vm5, %v1467_v41, %v1471_v21  ;;  %v3164_v21 = vld [vmem:[%s4218_s6 + $0x60] sm:$0xe] }
 0x119   : > { %2604 = vmatprep.mubr.bf16.mxu0 %v3089_v20  ;;  %v993_v52 = vor.u32 %v992_v42, %v989_v38  ;;  %v1008_v54 = vrot.slane %v1006_v43, 5  ;;  %v1576_v55 = vrot.slane %v3148_v35, 5  ;;  %v1477_v58 = vrot.slane %v1476_v45, 4  ;;  %v3166_v32 = vld [vmem:[%s4218_s6 + $0x68] sm:$0x1] }
 0x11a   : > { %v1003_v53 = vor.u32 %v1002_v46, %v998_v29  ;;  %v1574_v57 = vsel %vm4236_vm4, %v3170_v47, %v1573_v50  ;;  %v1575_v60 = vrot.slane %v1573_v50, 4  ;;  %v3174_v0 = vrot.slane %v3158_v40, 9  ;;  %v3156_v38 = vld [vmem:[%s4218_s6 + $0x40] sm:$0xf]  ;;  %v3167_v47 = vld [vmem:[%s4218_s6 + $0x6c] sm:$0xe] }
 0x11b   : > { %v994_v63 = vrot.slane %v993_v52, 4  ;;  %v1601_v1 = vrot.slane %v3159_v44, 5  ;;  %v1604_v2 = vrot.slane %v3160_v51, 5  ;;  %v1482_v4 = vsel %vm4242_vm5, %v1477_v58, %v1481_v37  ;;  %v3155_v37 = vld [vmem:[%s4218_s6 + $0x3c] sm:$0xe] }
 0x11c   : > { %v1004_v5 = vrot.slane %v1003_v53, 4  ;;  %v1577_v6 = vsel %vm4236_vm4, %v1575_v60, %v1576_v55  ;;  %v3171_v7 = vrot.slane %v3149_v56, 9  ;;  %v3145_v10 = vcombine.low %v1472_v26, %v1482_v4  ;;  %v3168_v50 = vld [vmem:[%s4218_s6 + $0x70] sm:$0xf]  ;;  %v3169_v55 = vld [vmem:[%s4218_s6 + $0x74] sm:$0x1] }
 0x11d   : > { %v999_v11 = vsel %vm4242_vm5, %v994_v63, %v998_v29  ;;  %v3178_v12 = vcombine.low %v1574_v57, %v1577_v6  ;;  %v1602_v13 = vsel %vm4236_vm4, %v3174_v0, %v1601_v1  ;;  %v1603_v19 = vrot.slane %v1601_v1, 4  ;;  %v3157_v29 = vld [vmem:[%s4218_s6 + $0x44] sm:$0x1] }
 0x11e   : > { %v1009_v18 = vsel %vm4242_vm5, %v1004_v5, %v1008_v54  ;;  %v1580_v20 = vrot.slane %v3150_v61, 5  ;;  %v1583_v14 = vrot.slane %v3151_v62, 5  ;;  %2701 = vmatprep.mubr.bf16.mxu1 %v3145_v10  ;;  %v3175_v23 = vrot.slane %v3161_v3, 9 }
 0x11f   : > { %v3049_v22 = vcombine.low %v999_v11, %v1009_v18  ;;  %v1608_v24 = vrot.slane %v3162_v8, 5  ;;  %v1611_v25 = vrot.slane %v3163_v9, 5  ;;  %2702 = vmatmul.mubr.bf16.gmra.mrb[60].mxu1 %v3786_v59  ;;  %v1605_v28 = vsel %vm4236_vm4, %v1603_v19, %v1604_v2 }
 0x120   : > { %v1581_v49 = vsel %vm4236_vm4, %v3171_v7, %v1580_v20  ;;  %v1582_v30 = vrot.slane %v1580_v20, 4  ;;  %v3172_v31 = vrot.slane %v3152_v15, 9  ;;  %v3182_v34 = vcombine.low %v1602_v13, %v1605_v28 }
 0x121   : > { %2605 = vmatmul.mubr.bf16.gmra.mrb[60].mxu0 %v3049_v22  ;;  %v1609_v33 = vsel %vm4236_vm4, %v3175_v23, %v1608_v24  ;;  %v1610_v35 = vrot.slane %v1608_v24, 4  ;;  %v1587_v36 = vrot.slane %v3153_v16, 5  ;;  %v1590_v40 = vrot.slane %v3154_v17, 5 }
 0x122   : > { %3554 = vmatprep.mubr.bf16.mxu0 %v3178_v12  ;;  %v1584_v39 = vsel %vm4236_vm4, %v1582_v30, %v1583_v14  ;;  %v3176_v41 = vrot.slane %v3164_v21, 9  ;;  %v1615_v42 = vrot.slane %v3165_v27, 5  ;;  %3562 = vmatprep.mubr.bf16.mxu1 %v3182_v34  ;;  %v1618_v54 = vrot.slane %v3166_v32, 5  ;;  %v4636_v12 = vld [vmem:[#allocation8] ss:$0 sm:$0xff] }
 0x123   : > { %v3179_v43 = vcombine.low %v1581_v49, %v1584_v39  ;;  %v1612_v44 = vsel %vm4236_vm4, %v1610_v35, %v1611_v25  ;;  %v1588_v45 = vsel %vm4236_vm4, %v3172_v31, %v1587_v36  ;;  %v1589_v46 = vrot.slane %v1587_v36, 4 }
 0x124   : > { %v3183_v51 = vcombine.low %v1609_v33, %v1612_v44  ;;  %v1616_v26 = vsel %vm4236_vm4, %v3176_v41, %v1615_v42  ;;  %v1617_v52 = vrot.slane %v1615_v42, 4  ;;  %v3173_v58 = vrot.slane %v3155_v37, 9 }
 0x125   : > { %v1591_v56 = vsel %vm4236_vm4, %v1589_v46, %v1590_v40  ;;  %v1594_v53 = vrot.slane %v3156_v38, 5  ;;  %v1597_v59 = vrot.slane %v3157_v29, 5  ;;  %v3177_v61 = vrot.slane %v3167_v47, 9 }
 0x126   : > { %v3180_v57 = vcombine.low %v1588_v45, %v1591_v56  ;;  %v1619_v60 = vsel %vm4236_vm4, %v1617_v52, %v1618_v54  ;;  %v1622_v62 = vrot.slane %v3168_v50, 5  ;;  %v1625_v1 = vrot.slane %v3169_v55, 5 }
 0x127   : > { %v3184_v63 = vcombine.low %v1616_v26, %v1619_v60  ;;  %v1596_v0 = vrot.slane %v1594_v53, 4  ;;  %3563 = vmatmul.mubr.bf16.vlgmr.msra.gmra.mrb[64].mxu1 %v3183_v51  ;;  %v1595_v4 = vsel %vm4236_vm4, %v3173_v58, %v1594_v53 }
 0x128   : > { %v1624_v2 = vrot.slane %v1622_v62, 4  ;;  %v1623_v3 = vsel %vm4236_vm4, %v3177_v61, %v1622_v62 }
 0x129   : > { %3555 = vmatmul.mubr.bf16.vlgmr.msra.gmra.mrb[64].mxu0 %v3179_v43  ;;  %3566 = vmatprep.mubr.bf16.mxu1 %v3184_v63  ;;  %v1598_v5 = vsel %vm4236_vm4, %v1596_v0, %v1597_v59 }
 0x12a   : > { %3558 = vmatprep.mubr.bf16.mxu0 %v3180_v57  ;;  %v1626_v6 = vsel %vm4236_vm4, %v1624_v2, %v1625_v1  ;;  %v3181_v8 = vcombine.low %v1595_v4, %v1598_v5 }
 0x12b   : > { %v3185_v7 = vcombine.low %v1623_v3, %v1626_v6 }
 0x12f   : > { %3567 = vmatmul.mubr.bf16.gmra.mrb[68].mxu1 %v3185_v7 }
 0x131   : > { %3559 = vmatmul.mubr.bf16.gmra.mrb[68].mxu0 %v3181_v8 }
 0x175   : > { %v3282_v10 = vpop.f32.mrb[0].mxu0 }
 0x176   : > { %v3346_v9 = vpop.f32.mrb[0].mxu1  ;;  %v3283_v13 = vpop.f32.mrb[1].mxu0 }
 0x177   : > { %v3347_v11 = vpop.f32.mrb[1].mxu1  ;;  %v3284_v17 = vadd.f32 %v3283_v13, %v3282_v10  ;;  %v3285_v18 = vpop.f32.mrb[2].mxu0 }
 0x178   : > { %v3348_v15 = vadd.f32 %v3347_v11, %v3346_v9  ;;  %v3349_v16 = vpop.f32.mrb[2].mxu1  ;;  %v3286_v20 = vpop.f32.mrb[3].mxu0 }
 0x179   : > { %v3350_v19 = vpop.f32.mrb[3].mxu1  ;;  %v2357_v48 = vadd.f32 %v3284_v17, %v4636_v12  ;;  %v3287_v21 = vadd.f32 %v3286_v20, %v3285_v18 }
 0x17a   : > { %v3351_v14 = vadd.f32 %v3350_v19, %v3349_v16 }
 0x17b   : > { %v4639_v22 = vadd.f32 %v3348_v15, %v2357_v48  ;;  %v2360_v23 = vadd.f32 %v3287_v21, %v4636_v12 }
 0x17d   : > { %v4642_v24 = vadd.f32 %v3351_v14, %v2360_v23  ;;  %v3288_v27 = vpop.f32.mrb[4].mxu0 }
 0x17e   : > { %v3352_v25 = vpop.f32.mrb[4].mxu1  ;;  %v3289_v49 = vpop.f32.mrb[5].mxu0 }
 0x17f   : > { %v3353_v28 = vpop.f32.mrb[5].mxu1  ;;  %v3290_v32 = vadd.f32 %v3289_v49, %v3288_v27  ;;  %v3291_v34 = vpop.f32.mrb[6].mxu0 }
 0x180   : > { %v3354_v30 = vadd.f32 %v3353_v28, %v3352_v25  ;;  %v3355_v31 = vpop.f32.mrb[6].mxu1  ;;  %v3292_v35 = vpop.f32.mrb[7].mxu0 }
 0x181   : > { %v3356_v33 = vpop.f32.mrb[7].mxu1  ;;  %v2365_v37 = vadd.f32 %v3290_v32, %v4636_v12  ;;  %v3293_v38 = vadd.f32 %v3292_v35, %v3291_v34 }
 0x182   : > { %v3357_v36 = vadd.f32 %v3356_v33, %v3355_v31 }
 0x183   : > { %v4645_v39 = vadd.f32 %v3354_v30, %v2365_v37  ;;  %v2368_v40 = vadd.f32 %v3293_v38, %v4636_v12 }
 0x185   : > { %v4648_v41 = vadd.f32 %v3357_v36, %v2368_v40  ;;  %v3294_v29 = vpop.f32.mrb[8].mxu0 }
 0x186   : > { %v3358_v42 = vpop.f32.mrb[8].mxu1  ;;  %v3295_v44 = vpop.f32.mrb[9].mxu0 }
 0x187   : > { %v3359_v43 = vpop.f32.mrb[9].mxu1  ;;  %v3296_v47 = vadd.f32 %v3295_v44, %v3294_v29  ;;  %v3297_v50 = vpop.f32.mrb[10].mxu0 }
 0x188   : > { %v3360_v45 = vadd.f32 %v3359_v43, %v3358_v42  ;;  %v3361_v46 = vpop.f32.mrb[10].mxu1  ;;  %v3298_v26 = vpop.f32.mrb[11].mxu0 }
 0x189   : > { %v3362_v51 = vpop.f32.mrb[11].mxu1  ;;  %v2373_v54 = vadd.f32 %v3296_v47, %v4636_v12  ;;  %v3299_v55 = vadd.f32 %v3298_v26, %v3297_v50 }
 0x18a   : > { %v3363_v52 = vadd.f32 %v3362_v51, %v3361_v46 }
 0x18b   : > { %v4651_v56 = vadd.f32 %v3360_v45, %v2373_v54  ;;  %v2376_v58 = vadd.f32 %v3299_v55, %v4636_v12 }
 0x18d   : > { %v4654_v53 = vadd.f32 %v3363_v52, %v2376_v58  ;;  %v3300_v57 = vpop.f32.mrb[12].mxu0 }
 0x18e   : > { %v3364_v59 = vpop.f32.mrb[12].mxu1  ;;  %v3301_v61 = vpop.f32.mrb[13].mxu0 }
 0x18f   : > { %v3365_v60 = vpop.f32.mrb[13].mxu1  ;;  %v3302_v0 = vadd.f32 %v3301_v61, %v3300_v57  ;;  %v3303_v1 = vpop.f32.mrb[14].mxu0 }
 0x190   : > { %v3366_v62 = vadd.f32 %v3365_v60, %v3364_v59  ;;  %v3367_v63 = vpop.f32.mrb[14].mxu1  ;;  %v3304_v3 = vpop.f32.mrb[15].mxu0 }
 0x191   : > { %v3368_v2 = vpop.f32.mrb[15].mxu1  ;;  %v2381_v5 = vadd.f32 %v3302_v0, %v4636_v12  ;;  %v3305_v6 = vadd.f32 %v3304_v3, %v3303_v1 }
 0x192   : > { %v3369_v4 = vadd.f32 %v3368_v2, %v3367_v63 }
 0x193   : > { %v4657_v7 = vadd.f32 %v3366_v62, %v2381_v5  ;;  %v2384_v8 = vadd.f32 %v3305_v6, %v4636_v12 }
 0x195   : > { %v4660_v9 = vadd.f32 %v3369_v4, %v2384_v8  ;;  %v3306_v11 = vpop.f32.mrb[16].mxu0 }
 0x196   : > { %v3370_v10 = vpop.f32.mrb[16].mxu1  ;;  %v3307_v15 = vpop.f32.mrb[17].mxu0 }
 0x197   : > { %v3371_v13 = vpop.f32.mrb[17].mxu1  ;;  %v3308_v18 = vadd.f32 %v3307_v15, %v3306_v11  ;;  %v3309_v19 = vpop.f32.mrb[18].mxu0 }
 0x198   : > { %v3372_v16 = vadd.f32 %v3371_v13, %v3370_v10  ;;  %v3373_v17 = vpop.f32.mrb[18].mxu1  ;;  %v3310_v14 = vpop.f32.mrb[19].mxu0 }
 0x199   : > { %v3374_v20 = vpop.f32.mrb[19].mxu1  ;;  %v2389_v21 = vadd.f32 %v3308_v18, %v4636_v12  ;;  %v3311_v23 = vadd.f32 %v3310_v14, %v3309_v19 }
 0x19a   : > { %v3375_v48 = vadd.f32 %v3374_v20, %v3373_v17 }
 0x19b   : > { %v4663_v25 = vadd.f32 %v3372_v16, %v2389_v21  ;;  %v2392_v27 = vadd.f32 %v3311_v23, %v4636_v12 }
 0x19d   : > { %v4666_v28 = vadd.f32 %v3375_v48, %v2392_v27  ;;  %v3312_v30 = vpop.f32.mrb[20].mxu0 }
 0x19e   : > { %v3376_v49 = vpop.f32.mrb[20].mxu1  ;;  %v3313_v32 = vpop.f32.mrb[21].mxu0 }
 0x19f   : > { %v3377_v31 = vpop.f32.mrb[21].mxu1  ;;  %v3314_v35 = vadd.f32 %v3313_v32, %v3312_v30  ;;  %v3315_v36 = vpop.f32.mrb[22].mxu0 }
 0x1a0   : > { %v3378_v34 = vadd.f32 %v3377_v31, %v3376_v49  ;;  %v3379_v33 = vpop.f32.mrb[22].mxu1  ;;  %v3316_v38 = vpop.f32.mrb[23].mxu0 }
 0x1a1   : > { %v3380_v37 = vpop.f32.mrb[23].mxu1  ;;  %v2397_v42 = vadd.f32 %v3314_v35, %v4636_v12  ;;  %v3317_v29 = vadd.f32 %v3316_v38, %v3315_v36 }
 0x1a2   : > { %v3381_v40 = vadd.f32 %v3380_v37, %v3379_v33 }
 0x1a3   : > { %v4669_v43 = vadd.f32 %v3378_v34, %v2397_v42  ;;  %v2400_v44 = vadd.f32 %v3317_v29, %v4636_v12 }
 0x1a5   : > { %v4672_v45 = vadd.f32 %v3381_v40, %v2400_v44  ;;  %v3318_v47 = vpop.f32.mrb[24].mxu0 }
 0x1a6   : > { %v3382_v46 = vpop.f32.mrb[24].mxu1  ;;  %v3319_v51 = vpop.f32.mrb[25].mxu0 }
 0x1a7   : > { %v3383_v50 = vpop.f32.mrb[25].mxu1  ;;  %v3320_v54 = vadd.f32 %v3319_v51, %v3318_v47  ;;  %v3321_v55 = vpop.f32.mrb[26].mxu0 }
 0x1a8   : > { %v3384_v26 = vadd.f32 %v3383_v50, %v3382_v46  ;;  %v3385_v52 = vpop.f32.mrb[26].mxu1  ;;  %v3322_v59 = vpop.f32.mrb[27].mxu0 }
 0x1a9   : > { %v3386_v58 = vpop.f32.mrb[27].mxu1  ;;  %v2405_v60 = vadd.f32 %v3320_v54, %v4636_v12  ;;  %v3323_v61 = vadd.f32 %v3322_v59, %v3321_v55 }
 0x1aa   : > { %v3387_v57 = vadd.f32 %v3386_v58, %v3385_v52 }
 0x1ab   : > { %v4675_v62 = vadd.f32 %v3384_v26, %v2405_v60  ;;  %v2408_v63 = vadd.f32 %v3323_v61, %v4636_v12 }
 0x1ad   : > { %v4678_v0 = vadd.f32 %v3387_v57, %v2408_v63  ;;  %v3324_v2 = vpop.f32.mrb[28].mxu0 }
 0x1ae   : > { %v3388_v1 = vpop.f32.mrb[28].mxu1  ;;  %v3325_v4 = vpop.f32.mrb[29].mxu0 }
 0x1af   : > { %v3389_v3 = vpop.f32.mrb[29].mxu1  ;;  %v3326_v8 = vadd.f32 %v3325_v4, %v3324_v2  ;;  %v3327_v10 = vpop.f32.mrb[30].mxu0 }
 0x1b0   : > { %v3390_v5 = vadd.f32 %v3389_v3, %v3388_v1  ;;  %v3391_v6 = vpop.f32.mrb[30].mxu1  ;;  %v3328_v13 = vpop.f32.mrb[31].mxu0 }
 0x1b1   : > { %v3392_v11 = vpop.f32.mrb[31].mxu1  ;;  %v2413_v16 = vadd.f32 %v3326_v8, %v4636_v12  ;;  %v3329_v17 = vadd.f32 %v3328_v13, %v3327_v10 }
 0x1b2   : > { %v3393_v15 = vadd.f32 %v3392_v11, %v3391_v6 }
 0x1b3   : > { %v4681_v18 = vadd.f32 %v3390_v5, %v2413_v16  ;;  %v2416_v19 = vadd.f32 %v3329_v17, %v4636_v12 }
 0x1b5   : > { %v4684_v20 = vadd.f32 %v3393_v15, %v2416_v19  ;;  %v3410_v27 = vpop.f32.mrb[32].mxu0 }
 0x1b6   : > { %v3474_v14 = vpop.f32.mrb[32].mxu1  ;;  %v3411_v30 = vpop.f32.mrb[33].mxu0 }
 0x1b7   : > { %v3475_v48 = vpop.f32.mrb[33].mxu1  ;;  %v3412_v32 = vadd.f32 %v3411_v30, %v3410_v27  ;;  %v3413_v34 = vpop.f32.mrb[34].mxu0 }
 0x1b8   : > { %v3476_v21 = vadd.f32 %v3475_v48, %v3474_v14  ;;  %v3477_v23 = vpop.f32.mrb[34].mxu1  ;;  %v3414_v33 = vpop.f32.mrb[35].mxu0 }
 0x1b9   : > { %v3478_v49 = vpop.f32.mrb[35].mxu1  ;;  %v2551_v35 = vadd.f32 %v3412_v32, %v4639_v22  ;;  %v3415_v36 = vadd.f32 %v3414_v33, %v3413_v34 }
 0x1ba   : > { %v3479_v31 = vadd.f32 %v3478_v49, %v3477_v23 }
 0x1bb   : > { %v2554_v37 = vadd.f32 %v3415_v36, %v4642_v24  ;;  %v4688_v38 = vadd.f32 %v3476_v21, %v2551_v35 }
 0x1bd   : > { %v4690_v40 = vadd.f32 %v3479_v31, %v2554_v37  ;;  %v3416_v29 = vpop.f32.mrb[36].mxu0 }
 0x1be   : > { %v3480_v12 = vpop.f32.mrb[36].mxu1  ;;  %v3417_v47 = vpop.f32.mrb[37].mxu0 }
 0x1bf   : > { %v3481_v42 = vpop.f32.mrb[37].mxu1  ;;  %v3418_v51 = vadd.f32 %v3417_v47, %v3416_v29  ;;  %v3419_v26 = vpop.f32.mrb[38].mxu0 }
 0x1c0   : > { %v3482_v44 = vadd.f32 %v3481_v42, %v3480_v12  ;;  %v3483_v46 = vpop.f32.mrb[38].mxu1  ;;  %v3420_v54 = vpop.f32.mrb[39].mxu0 }
 0x1c1   : > { %v3484_v50 = vpop.f32.mrb[39].mxu1  ;;  %v2559_v22 = vadd.f32 %v3418_v51, %v4645_v39  ;;  %v3421_v55 = vadd.f32 %v3420_v54, %v3419_v26 }
 0x1c2   : > { %v3485_v52 = vadd.f32 %v3484_v50, %v3483_v46 }
 0x1c3   : > { %v2562_v24 = vadd.f32 %v3421_v55, %v4648_v41  ;;  %v4694_v58 = vadd.f32 %v3482_v44, %v2559_v22 }
 0x1c5   : > { %v4696_v57 = vadd.f32 %v3485_v52, %v2562_v24 }
 0x1c6   : > { %v3486_v59 = vpop.f32.mrb[40].mxu1 }
 0x1c7   : > { %v3487_v60 = vpop.f32.mrb[41].mxu1 }
 0x1c8   : > { %v3488_v61 = vadd.f32 %v3487_v60, %v3486_v59  ;;  %v3489_v63 = vpop.f32.mrb[42].mxu1  ;;  %v3422_v1 = vpop.f32.mrb[40].mxu0 }
 0x1c9   : > { %v3490_v2 = vpop.f32.mrb[43].mxu1  ;;  %v3423_v3 = vpop.f32.mrb[41].mxu0 }
 0x1ca   : > { %v3491_v4 = vadd.f32 %v3490_v2, %v3489_v63  ;;  %v3424_v5 = vadd.f32 %v3423_v3, %v3422_v1  ;;  %v3425_v6 = vpop.f32.mrb[42].mxu0 }
 0x1cb   : > { %v3426_v8 = vpop.f32.mrb[43].mxu0 }
 0x1cc   : > { %v2567_v39 = vadd.f32 %v3424_v5, %v4651_v56  ;;  %v3427_v10 = vadd.f32 %v3426_v8, %v3425_v6 }
 0x1ce   : > { %v2570_v41 = vadd.f32 %v3427_v10, %v4654_v53  ;;  %v4700_v11 = vadd.f32 %v3488_v61, %v2567_v39 }
 0x1d0   : > { %v3492_v13 = vpop.f32.mrb[44].mxu1  ;;  %v4702_v15 = vadd.f32 %v3491_v4, %v2570_v41 }
 0x1d1   : > { %v3493_v16 = vpop.f32.mrb[45].mxu1 }
 0x1d2   : > { %v3494_v19 = vadd.f32 %v3493_v16, %v3492_v13  ;;  %v3495_v14 = vpop.f32.mrb[46].mxu1 }
 0x1d3   : > { %v3428_v17 = vpop.f32.mrb[44].mxu0  ;;  %v3496_v21 = vpop.f32.mrb[47].mxu1 }
 0x1d4   : > { %v3429_v48 = vpop.f32.mrb[45].mxu0  ;;  %v3497_v49 = vadd.f32 %v3496_v21, %v3495_v14 }
 0x1d5   : > { %v3430_v23 = vadd.f32 %v3429_v48, %v3428_v17  ;;  %v3431_v27 = vpop.f32.mrb[46].mxu0 }
 0x1d6   : > { %v3432_v30 = vpop.f32.mrb[47].mxu0 }
 0x1d7   : > { %v2575_v56 = vadd.f32 %v3430_v23, %v4657_v7  ;;  %v3433_v31 = vadd.f32 %v3432_v30, %v3431_v27 }
 0x1d8   : > { %v3498_v34 = vpop.f32.mrb[48].mxu1 }
 0x1d9   : > { %v2578_v53 = vadd.f32 %v3433_v31, %v4660_v9  ;;  %v4706_v32 = vadd.f32 %v3494_v19, %v2575_v56  ;;  %v3499_v35 = vpop.f32.mrb[49].mxu1 }
 0x1da   : > { %v3500_v37 = vadd.f32 %v3499_v35, %v3498_v34  ;;  %v3501_v12 = vpop.f32.mrb[50].mxu1 }
 0x1db   : > { %v4708_v33 = vadd.f32 %v3497_v49, %v2578_v53  ;;  %v3434_v36 = vpop.f32.mrb[48].mxu0  ;;  %v3502_v29 = vpop.f32.mrb[51].mxu1 }
 0x1dc   : > { %v3435_v42 = vpop.f32.mrb[49].mxu0  ;;  %v3503_v47 = vadd.f32 %v3502_v29, %v3501_v12 }
 0x1dd   : > { %v3436_v44 = vadd.f32 %v3435_v42, %v3434_v36  ;;  %v3437_v46 = vpop.f32.mrb[50].mxu0 }
 0x1de   : > { %v3438_v50 = vpop.f32.mrb[51].mxu0 }
 0x1df   : > { %v2583_v7 = vadd.f32 %v3436_v44, %v4663_v25  ;;  %v3439_v51 = vadd.f32 %v3438_v50, %v3437_v46 }
 0x1e0   : > { %v3504_v52 = vpop.f32.mrb[52].mxu1 }
 0x1e1   : > { %v2586_v9 = vadd.f32 %v3439_v51, %v4666_v28  ;;  %v2680_v26 = vadd.f32 %v3500_v37, %v2583_v7  ;;  %v3505_v22 = vpop.f32.mrb[53].mxu1 }
 0x1e2   : > { %v3506_v55 = vadd.f32 %v3505_v22, %v3504_v52  ;;  %v3507_v24 = vpop.f32.mrb[54].mxu1 }
 0x1e3   : > { %v4712_v54 = vadd.f32 %v3503_v47, %v2586_v9  ;;  %v3440_v59 = vpop.f32.mrb[52].mxu0  ;;  %v3508_v60 = vpop.f32.mrb[55].mxu1 }
 0x1e4   : > { %v3441_v61 = vpop.f32.mrb[53].mxu0  ;;  %v3509_v63 = vadd.f32 %v3508_v60, %v3507_v24 }
 0x1e5   : > { %v3442_v1 = vadd.f32 %v3441_v61, %v3440_v59  ;;  %v3443_v2 = vpop.f32.mrb[54].mxu0 }
 0x1e6   : > { %v3444_v3 = vpop.f32.mrb[55].mxu0 }
 0x1e7   : > { %v2591_v4 = vadd.f32 %v3442_v1, %v4669_v43  ;;  %v3445_v25 = vadd.f32 %v3444_v3, %v3443_v2 }
 0x1e8   : > { %v3510_v6 = vpop.f32.mrb[56].mxu1 }
 0x1e9   : > { %v2594_v5 = vadd.f32 %v3445_v25, %v4672_v45  ;;  %v2688_v28 = vadd.f32 %v3506_v55, %v2591_v4  ;;  %v3511_v39 = vpop.f32.mrb[57].mxu1 }
 0x1ea   : > { %v3512_v41 = vadd.f32 %v3511_v39, %v3510_v6  ;;  %v3513_v13 = vpop.f32.mrb[58].mxu1 }
 0x1eb   : > { %v2691_v8 = vadd.f32 %v3509_v63, %v2594_v5  ;;  %v3446_v10 = vpop.f32.mrb[56].mxu0  ;;  %v3514_v17 = vpop.f32.mrb[59].mxu1 }
 0x1ec   : > { %v3447_v16 = vpop.f32.mrb[57].mxu0  ;;  %v3515_v48 = vadd.f32 %v3514_v17, %v3513_v13 }
 0x1ed   : > { %v3448_v19 = vadd.f32 %v3447_v16, %v3446_v10  ;;  %v3449_v14 = vpop.f32.mrb[58].mxu0 }
 0x1ee   : > { %v3450_v21 = vpop.f32.mrb[59].mxu0 }
 0x1ef   : > { %v2599_v23 = vadd.f32 %v3448_v19, %v4675_v62  ;;  %v3451_v27 = vadd.f32 %v3450_v21, %v3449_v14 }
 0x1f1   : > { %v2602_v43 = vadd.f32 %v3451_v27, %v4678_v0  ;;  %v2696_v45 = vadd.f32 %v3512_v41, %v2599_v23 }
 0x1f2   : > { %v3516_v30 = vpop.f32.mrb[60].mxu1 }
 0x1f3   : > { %v4718_v49 = vadd.f32 %v3515_v48, %v2602_v43  ;;  %v3517_v31 = vpop.f32.mrb[61].mxu1 }
 0x1f4   : > { %v3452_v56 = vpop.f32.mrb[60].mxu0  ;;  %v3518_v34 = vadd.f32 %v3517_v31, %v3516_v30  ;;  %v3519_v35 = vpop.f32.mrb[62].mxu1 }
 0x1f5   : > { %v3453_v53 = vpop.f32.mrb[61].mxu0  ;;  %v3520_v12 = vpop.f32.mrb[63].mxu1 }
 0x1f6   : > { %v3454_v36 = vadd.f32 %v3453_v53, %v3452_v56  ;;  %v3455_v37 = vpop.f32.mrb[62].mxu0  ;;  %v3521_v29 = vadd.f32 %v3520_v12, %v3519_v35 }
 0x1f7   : > { %v3456_v42 = vpop.f32.mrb[63].mxu0 }
 0x1f8   : > { %v2607_v62 = vadd.f32 %v3454_v36, %v4681_v18  ;;  %v3457_v44 = vadd.f32 %v3456_v42, %v3455_v37 }
 0x1fa   : > { %v2610_v0 = vadd.f32 %v3457_v44, %v4684_v20  ;;  %v2704_v46 = vadd.f32 %v3518_v34, %v2607_v62  ;;  %v3564_v47 = vpop.f32.mrb[64].mxu1 }
 0x1fb   : > { %v2785_v7 = vadd.f32 %v3564_v47, %v2688_v28  ;;  %v2776_v51 = vpop.f32.mrb[65].mxu1 }
 0x1fc   : > { %v3556_v50 = vpop.f32.mrb[64].mxu0  ;;  %v2707_v9 = vadd.f32 %v3521_v29, %v2610_v0  ;;  %v2777_v55 = vadd.f32 %v2776_v51, %v2680_v26  ;;  %v3565_v24 = vpop.f32.mrb[66].mxu1 }
 0x1fd   : > { %v2753_v52 = vadd.f32 %v3556_v50, %v4694_v58  ;;  %v2744_v22 = vpop.f32.mrb[65].mxu0  ;;  %2817 = vst [vmem:[%s4724_s2 + $0x50] sm:$0xff] %v2785_v7  ;;  %v2788_v59 = vadd.f32 %v3565_v24, %v2691_v8  ;;  %v2779_v58 = vpop.f32.mrb[67].mxu1 }
 0x1fe   : > { %v2745_v18 = vadd.f32 %v2744_v22, %v4688_v38  ;;  %v3557_v20 = vpop.f32.mrb[66].mxu0  ;;  %2815 = vst [vmem:[%s4724_s2 + $0x40] sm:$0xff] %v2777_v55  ;;  %v2780_v61 = vadd.f32 %v2779_v58, %v4712_v54 }
 0x1ff   : > { %2809 = vst [vmem:[%s4724_s2 + $0x10] sm:$0xff] %v2753_v52  ;;  %v2756_v26 = vadd.f32 %v3557_v20, %v4696_v57  ;;  %v2747_v60 = vpop.f32.mrb[67].mxu0  ;;  %2818 = vst [vmem:[%s4724_s2 + $0x58] sm:$0xff] %v2788_v59 }
 0x200   : > { %2807 = vst [vmem:[%s4724_s2] sm:$0xff] %v2745_v18  ;;  %v2748_v63 = vadd.f32 %v2747_v60, %v4690_v40  ;;  %2816 = vst [vmem:[%s4724_s2 + $0x48] sm:$0xff] %v2780_v61 }
 0x201   : > { %2810 = vst [vmem:[%s4724_s2 + $0x18] sm:$0xff] %v2756_v26 }
 0x202   : > { %2808 = vst [vmem:[%s4724_s2 + $0x8] sm:$0xff] %v2748_v63  ;;  %v3568_v38 = vpop.f32.mrb[68].mxu1 }
 0x203   : > { %v2801_v2 = vadd.f32 %v3568_v38, %v2704_v46  ;;  %v2792_v3 = vpop.f32.mrb[69].mxu1 }
 0x204   : > { %v3560_v1 = vpop.f32.mrb[68].mxu0  ;;  %v2793_v4 = vadd.f32 %v2792_v3, %v2696_v45  ;;  %v3569_v25 = vpop.f32.mrb[70].mxu1 }
 0x205   : > { %v2769_v57 = vadd.f32 %v3560_v1, %v4706_v32  ;;  %v2760_v54 = vpop.f32.mrb[69].mxu0  ;;  %2821 = vst [vmem:[%s4724_s2 + $0x70] sm:$0xff] %v2801_v2  ;;  %v2804_v28 = vadd.f32 %v3569_v25, %v2707_v9  ;;  %v2795_v6 = vpop.f32.mrb[71].mxu1 }
 0x206   : > { %v2761_v40 = vadd.f32 %v2760_v54, %v4700_v11  ;;  %v3561_v5 = vpop.f32.mrb[70].mxu0  ;;  %2819 = vst [vmem:[%s4724_s2 + $0x60] sm:$0xff] %v2793_v4  ;;  %v2796_v39 = vadd.f32 %v2795_v6, %v4718_v49 }
 0x207   : > { %2813 = vst [vmem:[%s4724_s2 + $0x30] sm:$0xff] %v2769_v57  ;;  %v2772_v32 = vadd.f32 %v3561_v5, %v4708_v33  ;;  %v2763_v8 = vpop.f32.mrb[71].mxu0  ;;  %2822 = vst [vmem:[%s4724_s2 + $0x78] sm:$0xff] %v2804_v28 }
 0x208   : > { %2811 = vst [vmem:[%s4724_s2 + $0x20] sm:$0xff] %v2761_v40  ;;  %v2764_v11 = vadd.f32 %v2763_v8, %v4702_v15  ;;  %2820 = vst [vmem:[%s4724_s2 + $0x68] sm:$0xff] %v2796_v39 }
 0x209   : > { %2814 = vst [vmem:[%s4724_s2 + $0x38] sm:$0xff] %v2772_v32 }
 0x20a   : > { %2812 = vst [vmem:[%s4724_s2 + $0x28] sm:$0xff] %v2764_v11 }
 0x20b   : > { %3887 = shalt.err (!%p3884_p7)
}
 0x20c   : > { %s3888_s11 = scalar_lea.hbm %s4751_s21, 2048  ;;  %s3892_s6 = scalar_lea.hbm %s4816_s3, 8192 }
 0x20d   : > { %p3889_p12 = scmp.ne.s32.totalorder %s4751_s21, %s3888_s11  ;;  %p3893_p5 = scmp.lt.u32.totalorder %s4751_s21, %s4816_s3 }
 0x20e   : > { %p3894_p9 = scmp.lt.u32.totalorder %s3892_s6, %s3888_s11  ;;  %p3896_p4 = scmp.lt.u32.totalorder %s3888_s11, %s4751_s21 }
 0x20f   : > { %p3890_p1 = pnand %p3889_p12, %p4153_p11 }
 0x210   : > { %p3895_p0 = por %p3894_p9, %p3893_p5 }
 0x211   : > { %p3891_p2 = pneg %p3890_p1 }
 0x212   : > { %p3897_p6 = por %p3896_p4, %p3895_p0 }
 0x214   : > { %p3898_p8 = pnand %p3897_p6, %p3891_p2 }
 0x216   : > { %3901 = shalt.err (!%p3898_p8)
}
 0x217   : > { %s3984_s18 = smov 128   ;;  %s3985_s22 = smov 8  }
 0x218   : > { %3599 = dma.vmem_to_hbm [thread:$0]  (%p4153_p11), %s4753_s24, 2048, %s4751_s21, %s2824_s10, %s3984_s18, %s3984_s18, %s3985_s22  }
 0x219 PF: > { %p3621_p10 = scmp.ge.s32.totalorder %s3976_s19, 2  ;;  %s2854_s16 = sand.u32 1, %s3948_s12  }
 0x21a   : > { %p4848_p13 = scmp.ne.s32.totalorder %s4830_s25, 0  ;;  %s2855_s15 = scalar_lea.sflag [#allocation5], %s2854_s16 }
 0x21c   : > { %p3613_p3 = pnand %p3621_p10, %p4848_p13 }
 0x21e   : > { %3943 = dma.done.wait (!%p3613_p3), %s2855_s15, 2048  }
 0x21f   : > { %3945 = vsyncadd (!%p3613_p3), %s2855_s15, 4294965248  ;;  %s20_s19 = sadd.s32 1, %s3976_s19   ;;  %s4849_s16 = sld [smem:[#allocation13_spill]] }
 0x220   : > { %p17_p7 = scmp.ge.s32.totalorder %s20_s19, 6   ;;  %s4850_s12 = smov %s3952_s13 }
 0x221   : > { %s4851_s13 = smov %s3956_s14  ;;  %s4852_s14 = smov %s4176_s9 }
 0x222   : > { %s4853_s15 = smov %s3968_s17  ;;  %s4854_s17 = smov %s4857_s7 }
 0x223   : > { %s4855_s18 = smov %s4861_s8  ;;  %19 = sbr.rel (!%p17_p7) target bundleno = 11 (0xb), region = 87 }
 0x22a   :  { %2860 = vsyncpa [#allocation4], 1 }
 0x22b   :  { %2862 = vsyncpa [#allocation4 + $0x1], 1 }
 0x22c   :  { %2863 = vsyncpa [#allocation7], 1 }
 0x22d   :  { %2864 = vsyncpa [#allocation5], 1 }
 0x22e   :  { %2866 = vsyncpa [#allocation5 + $0x1], 1 }

</bundles_post_ra>
